<compile_context>
chip_gen: v5e
topology: v5e:2x2
jax: 0.10.0
libtpu: 0.0.40
codegen_flags: <defaults>
</compile_context>

<pallas_src>
import functools
import math

import jax
import jax.numpy as jnp
from jax.experimental import pallas as pl
from jax.experimental.pallas import tpu as pltpu


# ----------------------------------------------------------------------------
# Fused encoder stack + heads kernel
# ----------------------------------------------------------------------------
def fused_encoder_kernel(
    # inputs
    x_hbm,                                   # (B*S, D) embeddings, HBM (ANY)
    wq_ref, wk_ref, wv_ref,                  # (D, D) bf16   (layer axis squeezed)
    bq_ref, bk_ref, bv_ref,                  # (1, D) f32
    wo_ref, bo_ref,                          # (D, D) bf16 / (1, D) f32
    ln1g_ref, ln1b_ref,                      # (1, D) f32
    w1_ref, b1_ref,                          # (D, 4D) bf16 / (1, 4D) f32
    w2_ref, b2_ref,                          # (4D, D) bf16 / (1, D) f32
    ln2g_ref, ln2b_ref,                      # (1, D) f32
    wc_ref, bc_ref,                          # (D, 2) / (1, 2) f32  head weights
    wvar_ref, bvar_ref,                      # (D, 1) / (1, 1) f32  head weights
    # outputs
    o_ref,                                   # (blk_rows, D) resident activation
    pooled_ref,                              # (batch_block, D)
    logits_ref,                              # (batch_block, 2)
    vprob_ref,                               # (batch_block, 1)
    # scratch
    copy_sem,                                # DMA semaphore
    *, num_heads: int, seq: int, batch_block: int, blk_rows: int,
):
    bb = pl.program_id(0)
    layer = pl.program_id(1)

    # Layer 0: DMA the embeddings for this batch block straight into the
    # resident output block (no separate double-buffered VMEM input).
    @pl.when(layer == 0)
    def _():
        cp = pltpu.make_async_copy(
            x_hbm.at[pl.ds(bb * blk_rows, blk_rows), :], o_ref, copy_sem)
        cp.start()
        cp.wait()

    x = o_ref[...]                                    # (blk_rows, D) f32
    D = x.shape[-1]
    dh = D // num_heads
    eps = 1e-5

    # ---- self attention (scale already folded into Wq / bq) -----------------
    xb = x.astype(jnp.bfloat16)
    q = jnp.dot(xb, wq_ref[...], preferred_element_type=jnp.float32) + bq_ref[...]
    k = jnp.dot(xb, wk_ref[...], preferred_element_type=jnp.float32) + bk_ref[...]
    v = jnp.dot(xb, wv_ref[...], preferred_element_type=jnp.float32) + bv_ref[...]

    wo = wo_ref[...]                                  # (D, D) bf16, hoisted
    batch_rows = []
    # TODO(synk): for large batch_block switch to lax.fori_loop (bounded live ranges).
    for b in range(batch_block):                      # static loops, tiny matmuls
        r0 = b * seq
        acc = None
        for h in range(num_heads):
            c0 = h * dh
            qh = q[r0:r0 + seq, c0:c0 + dh].astype(jnp.bfloat16)   # (S, dh)
            kh = k[r0:r0 + seq, c0:c0 + dh].astype(jnp.bfloat16)   # (S, dh)
            vh = v[r0:r0 + seq, c0:c0 + dh].astype(jnp.bfloat16)   # (S, dh)
            # q @ k.T without materializing a transpose.
            s = jax.lax.dot_general(
                qh, kh, dimension_numbers=(((1,), (1,)), ((), ())),
                preferred_element_type=jnp.float32)                # (S, S) f32
            s = s - jnp.max(s, axis=-1, keepdims=True)
            p = jnp.exp(s)
            p = p * pl.reciprocal(jnp.sum(p, axis=-1, keepdims=True), approx=True)
            pv = jnp.dot(p.astype(jnp.bfloat16), vh,
                         preferred_element_type=jnp.float32)       # (S, dh)
            # Per-head output projection accumulation (no lane-dim concat).
            contrib = jnp.dot(pv.astype(jnp.bfloat16), wo[c0:c0 + dh, :],
                              preferred_element_type=jnp.float32)  # (S, D)
            acc = contrib if acc is None else acc + contrib
        batch_rows.append(acc)
    attn_out = batch_rows[0] if batch_block == 1 else jnp.concatenate(batch_rows, axis=0)
    attn_out = attn_out + bo_ref[...]                              # (blk_rows, D)

    # ---- residual + LayerNorm 1 (post-norm), all f32 -------------------------
    y = x + attn_out
    mu = jnp.mean(y, axis=-1, keepdims=True)
    var = jnp.mean(jnp.square(y - mu), axis=-1, keepdims=True)
    y = (y - mu) * jax.lax.rsqrt(var + eps) * ln1g_ref[...] + ln1b_ref[...]

    # ---- feed-forward (Linear -> ReLU -> Linear) ------------------------------
    h1 = jnp.dot(y.astype(jnp.bfloat16), w1_ref[...],
                 preferred_element_type=jnp.float32) + b1_ref[...]
    h1 = jnp.maximum(h1, 0.0)
    h2 = jnp.dot(h1.astype(jnp.bfloat16), w2_ref[...],
                 preferred_element_type=jnp.float32) + b2_ref[...]

    # ---- residual + LayerNorm 2 -----------------------------------------------
    z = y + h2
    mu2 = jnp.mean(z, axis=-1, keepdims=True)
    var2 = jnp.mean(jnp.square(z - mu2), axis=-1, keepdims=True)
    z = (z - mu2) * jax.lax.rsqrt(var2 + eps) * ln2g_ref[...] + ln2b_ref[...]

    o_ref[...] = z

    # ---- fused heads on the last layer (no second pallas_call / HBM re-read) --
    @pl.when(layer == pl.num_programs(1) - 1)
    def _():
        rows = [jnp.mean(z[b * seq:(b + 1) * seq, :], axis=0, keepdims=True)
                for b in range(batch_block)]
        pooled = rows[0] if batch_block == 1 else jnp.concatenate(rows, axis=0)
        pooled_ref[...] = pooled                                   # (batch_block, D)
        logits_ref[...] = (jnp.dot(pooled, wc_ref[...],
                                   preferred_element_type=jnp.float32) + bc_ref[...])
        vlin = (jnp.dot(pooled, wvar_ref[...],
                        preferred_element_type=jnp.float32) + bvar_ref[...])
        vprob_ref[...] = 1.0 / (1.0 + jnp.exp(-vlin))


# ----------------------------------------------------------------------------
# Wrapper
# ----------------------------------------------------------------------------
def _pick_batch_block(batch: int) -> int:
    """On v7x (2 TCs/chip) split the batch so the 'parallel' axis has size 2."""
    try:
        kind = jax.devices()[0].device_kind.lower()
    except Exception:  # pragma: no cover - defensive
        kind = ""
    if "v7" in kind and batch >= 2 and batch % 2 == 0:
        return batch // 2
    return batch


def run_encoder_and_heads(x_flat, stacked, head, *, num_heads, num_layers,
                          batch, seq, batch_block=None):
    """x_flat: (B*S, D) f32.  stacked: (L, ...) pre-transposed weight stacks."""
    BS, D = x_flat.shape
    if batch_block is None:
        batch_block = _pick_batch_block(batch)
    assert batch % batch_block == 0
    nb = batch // batch_block          # "parallel" grid axis (megacore / v7x)
    blk_rows = batch_block * seq

    layer_weights = (stacked["wq_t"], stacked["wk_t"], stacked["wv_t"],
                     stacked["bq"], stacked["bk"], stacked["bv"],
                     stacked["wo_t"], stacked["bo"],
                     stacked["ln1g"], stacked["ln1b"],
                     stacked["w1_t"], stacked["b1"],
                     stacked["w2_t"], stacked["b2"],
                     stacked["ln2g"], stacked["ln2b"])
    head_weights = (head["wc_t"], head["bc"], head["wv_t"], head["bv"])

    # Leading layer axis squeezed; index depends only on the layer grid index,
    # so Pallas double-buffers layer l+1 weights behind layer l compute.
    layer_specs = [pl.BlockSpec((None,) + tuple(w.shape[1:]),
                                lambda bb, l: (l, 0, 0))
                   for w in layer_weights]
    # Head weights: constant index -> loaded once, resident.
    head_specs = [pl.BlockSpec(tuple(w.shape), lambda bb, l: (0, 0))
                  for w in head_weights]
    # Embedding input stays in HBM; copied manually into the output block at l=0.
    x_spec = pl.BlockSpec(memory_space=pl.ANY)

    out_shapes = (
        jax.ShapeDtypeStruct((BS, D), jnp.float32),      # encoded (hidden states)
        jax.ShapeDtypeStruct((batch, D), jnp.float32),   # pooled
        jax.ShapeDtypeStruct((batch, 2), jnp.float32),   # sequence_logits
        jax.ShapeDtypeStruct((batch, 1), jnp.float32),   # variant_probability
    )
    # Output index constant across the layer axis -> VMEM-resident activation,
    # written to HBM once per batch block.
    out_specs = [
        pl.BlockSpec((blk_rows, D), lambda bb, l: (bb, 0)),
        pl.BlockSpec((batch_block, D), lambda bb, l: (bb, 0)),
        pl.BlockSpec((batch_block, 2), lambda bb, l: (bb, 0)),
        pl.BlockSpec((batch_block, 1), lambda bb, l: (bb, 0)),
    ]

    bytes_of = lambda a: int(a.size) * int(a.dtype.itemsize)
    total_w_bytes = sum(bytes_of(w) for w in layer_weights)
    per_layer_w_bytes = total_w_bytes // num_layers
    head_bytes = sum(bytes_of(w) for w in head_weights)

    # Explicit VMEM budget: double-buffered per-layer weights + resident
    # activation block + intermediates headroom, clamped to be v7x-safe (64 MiB).
    act_bytes = blk_rows * D * 4
    est = 3 * per_layer_w_bytes + 12 * act_bytes + head_bytes + (1 << 22)
    vmem_limit = int(min(max(est, 32 * 1024 * 1024), 64 * 1024 * 1024))

    # Advisory cost estimate for the XLA scheduler.
    flops_layer = 24 * BS * D * D + 4 * batch * seq * seq * D
    transc_layer = batch * num_heads * seq * seq + 4 * BS
    cost = pl.CostEstimate(
        flops=int(num_layers * flops_layer + 6 * batch * D),
        transcendentals=int(num_layers * transc_layer + batch),
        bytes_accessed=int(nb * total_w_bytes + head_bytes + 2 * BS * D * 4),
    )

    # TODO(synk): for large D on v7x (64 MiB VMEM), additionally tile the FFN 4D
    # dimension of w1/w2 with an inner grid axis so double-buffered weights fit.
    return pl.pallas_call(
        functools.partial(fused_encoder_kernel, num_heads=num_heads, seq=seq,
                          batch_block=batch_block, blk_rows=blk_rows),
        out_shape=out_shapes,
        grid_spec=pltpu.PrefetchScalarGridSpec(
            num_scalar_prefetch=0,
            grid=(nb, num_layers),
            in_specs=[x_spec] + layer_specs + head_specs,
            out_specs=out_specs,
            scratch_shapes=[pltpu.SemaphoreType.DMA(())],
        ),
        compiler_params=pltpu.CompilerParams(
            dimension_semantics=("parallel", "arbitrary"),
            vmem_limit_bytes=vmem_limit),
        cost_estimate=cost,
        input_output_aliases={0: 0},     # embeddings buffer reused for encoded
    )(x_flat, *layer_weights, *head_weights)


def genomics_transformer_forward(input_ids, params, *, num_heads, num_layers,
                                 batch_block=None):
    B, S = input_ids.shape
    D = params["token_emb"].shape[1]
    # Embedding lookups (gather) stay in plain JAX.
    token_embeds = jnp.take(params["token_emb"], input_ids, axis=0)   # (B, S, D)
    pos_embeds = params["pos_emb"][:S][None, :, :]                    # (1, S, D)
    x = (token_embeds + pos_embeds).astype(jnp.float32)
    # dropout -> identity (eval mode)
    x_flat = x.reshape(B * S, D)

    encoded_flat, pooled, logits, vprob = run_encoder_and_heads(
        x_flat, params["stacked"], params["head"], num_heads=num_heads,
        num_layers=num_layers, batch=B, seq=S, batch_block=batch_block)

    return {
        "sequence_logits": logits,
        "variant_probability": vprob,
        "hidden_states": encoded_flat.reshape(B, S, D),
        "pooled_representation": pooled,
    }


# ----------------------------------------------------------------------------
# Deterministic parameter construction (PyTorch (out,in) convention, then
# pre-transposed, layer-stacked, bf16-cast, and Q-scale-folded once in JAX).
# ----------------------------------------------------------------------------
def init_params(key, vocab_size, embed_dim, num_heads, num_layers, max_length):
    D = embed_dim
    ff = 4 * D
    dh = D // num_heads
    attn_scale = 1.0 / math.sqrt(dh)
    ks = jax.random.split(key, 4 + num_layers)

    def nrm(k, shape, scale=0.02):
        return (scale * jax.random.normal(k, shape)).astype(jnp.float32)

    layers = []
    for l in range(num_layers):
        lk = jax.random.split(ks[4 + l], 6)
        layers.append(dict(
            wq=nrm(lk[0], (D, D)), wk=nrm(lk[1], (D, D)), wv=nrm(lk[2], (D, D)),
            bq=jnp.zeros((1, D), jnp.float32), bk=jnp.zeros((1, D), jnp.float32),
            bv=jnp.zeros((1, D), jnp.float32),
            wo=nrm(lk[3], (D, D)), bo=jnp.zeros((1, D), jnp.float32),
            ln1g=jnp.ones((1, D), jnp.float32), ln1b=jnp.zeros((1, D), jnp.float32),
            w1=nrm(lk[4], (ff, D)), b1=jnp.zeros((1, ff), jnp.float32),
            w2=nrm(lk[5], (D, ff)), b2=jnp.zeros((1, D), jnp.float32),
            ln2g=jnp.ones((1, D), jnp.float32), ln2b=jnp.zeros((1, D), jnp.float32),
        ))

    def stack_t(name, dtype=jnp.bfloat16):
        return jnp.stack([layers[l][name].T for l in range(num_layers)], 0).astype(dtype)

    def stack(name):
        return jnp.stack([layers[l][name] for l in range(num_layers)], 0)

    stacked = {
        # 1/sqrt(head_dim) folded into the Q projection (weight AND bias).
        "wq_t": (jnp.stack([layers[l]["wq"].T for l in range(num_layers)], 0)
                 * attn_scale).astype(jnp.bfloat16),        # (L, D, D) bf16
        "wk_t": stack_t("wk"),                              # (L, D, D) bf16
        "wv_t": stack_t("wv"),                              # (L, D, D) bf16
        "bq": stack("bq") * attn_scale,                     # (L, 1, D) f32
        "bk": stack("bk"), "bv": stack("bv"),
        "wo_t": stack_t("wo"), "bo": stack("bo"),           # (L, D, D) bf16
        "ln1g": stack("ln1g"), "ln1b": stack("ln1b"),
        "w1_t": stack_t("w1"), "b1": stack("b1"),           # (L, D, 4D) bf16
        "w2_t": stack_t("w2"), "b2": stack("b2"),           # (L, 4D, D) bf16
        "ln2g": stack("ln2g"), "ln2b": stack("ln2b"),
    }

    params = {
        "token_emb": nrm(ks[0], (vocab_size, D)),
        "pos_emb": nrm(ks[1], (max_length, D)),
        "head": {
            "wc_t": nrm(ks[2], (2, D)).T,                   # (D, 2) f32
            "bc": jnp.zeros((1, 2), jnp.float32),
            "wv_t": nrm(ks[3], (1, D)).T,                   # (D, 1) f32
            "bv": jnp.zeros((1, 1), jnp.float32),
        },
        "stacked": stacked,
    }
    return params


# ----------------------------------------------------------------------------
if __name__ == "__main__":
    # Small shapes consistent with the module's forward.
    VOCAB = 6
    EMBED_DIM = 32
    NUM_HEADS = 4
    NUM_LAYERS = 2
    MAX_LENGTH = 64
    BATCH = 2
    SEQ = 16

    root = jax.random.PRNGKey(0)
    k_param, k_ids = jax.random.split(root)
    params = init_params(k_param, VOCAB, EMBED_DIM, NUM_HEADS, NUM_LAYERS, MAX_LENGTH)
    input_ids = jax.random.randint(k_ids, (BATCH, SEQ), 0, VOCAB, dtype=jnp.int32)

    fwd = jax.jit(
        functools.partial(
            genomics_transformer_forward, num_heads=NUM_HEADS, num_layers=NUM_LAYERS
        )
    )
    out = fwd(input_ids, params)
    jax.block_until_ready(out)

    assert out["sequence_logits"].shape == (BATCH, 2)
    assert out["variant_probability"].shape == (BATCH, 1)
    assert out["hidden_states"].shape == (BATCH, SEQ, EMBED_DIM)
    assert out["pooled_representation"].shape == (BATCH, EMBED_DIM)
    assert bool(jnp.all(jnp.isfinite(out["hidden_states"])))
    assert bool(jnp.all(jnp.isfinite(out["sequence_logits"])))
    assert bool(jnp.all((out["variant_probability"] >= 0.0)
                        & (out["variant_probability"] <= 1.0)))
    print("KERNEL_OK")
</pallas_src>

<mosaic_0001>
module attributes {stable_mosaic.version = 11 : i64} {
  func.func @fused_encoder_kernel(%arg0: i32, %arg1: i32, %arg2: memref<32x32xf32, #tpu.memory_space<any>>, %arg3: memref<1x32x32xbf16, #tpu.memory_space<vmem>>, %arg4: memref<1x32x32xbf16, #tpu.memory_space<vmem>>, %arg5: memref<1x32x32xbf16, #tpu.memory_space<vmem>>, %arg6: memref<1x1x32xf32, #tpu.memory_space<vmem>>, %arg7: memref<1x1x32xf32, #tpu.memory_space<vmem>>, %arg8: memref<1x1x32xf32, #tpu.memory_space<vmem>>, %arg9: memref<1x32x32xbf16, #tpu.memory_space<vmem>>, %arg10: memref<1x1x32xf32, #tpu.memory_space<vmem>>, %arg11: memref<1x1x32xf32, #tpu.memory_space<vmem>>, %arg12: memref<1x1x32xf32, #tpu.memory_space<vmem>>, %arg13: memref<1x32x128xbf16, #tpu.memory_space<vmem>>, %arg14: memref<1x1x128xf32, #tpu.memory_space<vmem>>, %arg15: memref<1x128x32xbf16, #tpu.memory_space<vmem>>, %arg16: memref<1x1x32xf32, #tpu.memory_space<vmem>>, %arg17: memref<1x1x32xf32, #tpu.memory_space<vmem>>, %arg18: memref<1x1x32xf32, #tpu.memory_space<vmem>>, %arg19: memref<32x2xf32, #tpu.memory_space<vmem>>, %arg20: memref<1x2xf32, #tpu.memory_space<vmem>>, %arg21: memref<32x1xf32, #tpu.memory_space<vmem>>, %arg22: memref<1x1xf32, #tpu.memory_space<vmem>>, %arg23: memref<32x32xf32, #tpu.memory_space<vmem>>, %arg24: memref<2x32xf32, #tpu.memory_space<vmem>>, %arg25: memref<2x2xf32, #tpu.memory_space<vmem>>, %arg26: memref<2x1xf32, #tpu.memory_space<vmem>>, %arg27: memref<!tpu.dma_semaphore, #tpu.memory_space<semaphore_mem>>) attributes {dimension_semantics = [#tpu.dimension_semantics<parallel>, #tpu.dimension_semantics<arbitrary>], iteration_bounds = array<i64: 1, 2>, scalar_prefetch = 0 : i64, scratch_operands = 1 : i64, tpu.core_type = #tpu.core_type<tc>, window_params = [{}, {transform_indices = @transform_1, window_bounds = array<i64: 1, 32, 32>}, {transform_indices = @transform_2, window_bounds = array<i64: 1, 32, 32>}, {transform_indices = @transform_3, window_bounds = array<i64: 1, 32, 32>}, {transform_indices = @transform_4, window_bounds = array<i64: 1, 1, 32>}, {transform_indices = @transform_5, window_bounds = array<i64: 1, 1, 32>}, {transform_indices = @transform_6, window_bounds = array<i64: 1, 1, 32>}, {transform_indices = @transform_7, window_bounds = array<i64: 1, 32, 32>}, {transform_indices = @transform_8, window_bounds = array<i64: 1, 1, 32>}, {transform_indices = @transform_9, window_bounds = array<i64: 1, 1, 32>}, {transform_indices = @transform_10, window_bounds = array<i64: 1, 1, 32>}, {transform_indices = @transform_11, window_bounds = array<i64: 1, 32, 128>}, {transform_indices = @transform_12, window_bounds = array<i64: 1, 1, 128>}, {transform_indices = @transform_13, window_bounds = array<i64: 1, 128, 32>}, {transform_indices = @transform_14, window_bounds = array<i64: 1, 1, 32>}, {transform_indices = @transform_15, window_bounds = array<i64: 1, 1, 32>}, {transform_indices = @transform_16, window_bounds = array<i64: 1, 1, 32>}, {pipeline_mode = #tpu.pipeline_mode<synchronous>, transform_indices = @transform_17, window_bounds = array<i64: 32, 2>}, {pipeline_mode = #tpu.pipeline_mode<synchronous>, transform_indices = @transform_18, window_bounds = array<i64: 1, 2>}, {pipeline_mode = #tpu.pipeline_mode<synchronous>, transform_indices = @transform_19, window_bounds = array<i64: 32, 1>}, {pipeline_mode = #tpu.pipeline_mode<synchronous>, transform_indices = @transform_20, window_bounds = array<i64: 1, 1>}, {transform_indices = @transform_21, window_bounds = array<i64: 32, 32>}, {transform_indices = @transform_22, window_bounds = array<i64: 2, 32>}, {transform_indices = @transform_23, window_bounds = array<i64: 2, 2>}, {transform_indices = @transform_24, window_bounds = array<i64: 2, 1>}]} {
    %c0_i32 = arith.constant 0 : i32
    %0 = arith.cmpi eq, %arg1, %c0_i32 : i32
    %1 = arith.extui %0 : i1 to i32
    %c0_i32_0 = arith.constant 0 : i32
    %2 = arith.cmpi ne, %1, %c0_i32_0 : i32
    scf.if %2 {
      %c32_i32 = arith.constant 32 : i32
      %291 = arith.muli %arg0, %c32_i32 : i32
      %c0_i32_108 = arith.constant 0 : i32
      %292 = tpu.memref_slice %arg2[%291, %c0_i32_108] : memref<32x32xf32, #tpu.memory_space<any>> -> memref<32x32xf32, #tpu.memory_space<any>>
      tpu.enqueue_dma source(%292 : memref<32x32xf32, #tpu.memory_space<any>>) target(%arg23 : memref<32x32xf32, #tpu.memory_space<vmem>>) target_semaphore(%arg27 : memref<!tpu.dma_semaphore, #tpu.memory_space<semaphore_mem>>)
      %c0_i32_109 = arith.constant 0 : i32
      %293 = tpu.memref_slice %arg2[%291, %c0_i32_109] : memref<32x32xf32, #tpu.memory_space<any>> -> memref<32x32xf32, #tpu.memory_space<any>>
      tpu.wait_dma2 semaphore(%arg27 : memref<!tpu.dma_semaphore, #tpu.memory_space<semaphore_mem>>) src(%293 : memref<32x32xf32, #tpu.memory_space<any>>) dst(%arg23 : memref<32x32xf32, #tpu.memory_space<vmem>>)
    } else {
    }
    %c0 = arith.constant 0 : index
    %c0_1 = arith.constant 0 : index
    %3 = vector.load %arg23[%c0, %c0_1] : memref<32x32xf32, #tpu.memory_space<vmem>>, vector<32x32xf32>
    %4 = arith.truncf %3 : vector<32x32xf32> to vector<32x32xbf16>
    %c0_2 = arith.constant 0 : index
    %c0_3 = arith.constant 0 : index
    %c0_4 = arith.constant 0 : index
    %5 = vector.load %arg3[%c0_2, %c0_3, %c0_4] : memref<1x32x32xbf16, #tpu.memory_space<vmem>>, vector<1x32x32xbf16>
    %6 = vector.shape_cast %5 : vector<1x32x32xbf16> to vector<32x32xbf16>
    %cst = arith.constant dense<0.000000e+00> : vector<32x32xf32>
    %7 = tpu.matmul %4, %6, %cst {dimension_numbers = #tpu.dot_dimension_numbers<[1], [0], [0], [1], [0, 0, 1, 1], [], []>} : vector<32x32xbf16>, vector<32x32xbf16>, vector<32x32xf32> -> vector<32x32xf32>
    %c0_5 = arith.constant 0 : index
    %c0_6 = arith.constant 0 : index
    %c0_7 = arith.constant 0 : index
    %8 = vector.load %arg6[%c0_5, %c0_6, %c0_7] : memref<1x1x32xf32, #tpu.memory_space<vmem>>, vector<1x1x32xf32>
    %9 = vector.shape_cast %8 : vector<1x1x32xf32> to vector<1x32xf32>
    %10 = vector.broadcast %9 : vector<1x32xf32> to vector<32x32xf32>
    %11 = arith.addf %7, %10 : vector<32x32xf32>
    %c0_8 = arith.constant 0 : index
    %c0_9 = arith.constant 0 : index
    %c0_10 = arith.constant 0 : index
    %12 = vector.load %arg4[%c0_8, %c0_9, %c0_10] : memref<1x32x32xbf16, #tpu.memory_space<vmem>>, vector<1x32x32xbf16>
    %13 = vector.shape_cast %12 : vector<1x32x32xbf16> to vector<32x32xbf16>
    %cst_11 = arith.constant dense<0.000000e+00> : vector<32x32xf32>
    %14 = tpu.matmul %4, %13, %cst_11 {dimension_numbers = #tpu.dot_dimension_numbers<[1], [0], [0], [1], [0, 0, 1, 1], [], []>} : vector<32x32xbf16>, vector<32x32xbf16>, vector<32x32xf32> -> vector<32x32xf32>
    %c0_12 = arith.constant 0 : index
    %c0_13 = arith.constant 0 : index
    %c0_14 = arith.constant 0 : index
    %15 = vector.load %arg7[%c0_12, %c0_13, %c0_14] : memref<1x1x32xf32, #tpu.memory_space<vmem>>, vector<1x1x32xf32>
    %16 = vector.shape_cast %15 : vector<1x1x32xf32> to vector<1x32xf32>
    %17 = vector.broadcast %16 : vector<1x32xf32> to vector<32x32xf32>
    %18 = arith.addf %14, %17 : vector<32x32xf32>
    %c0_15 = arith.constant 0 : index
    %c0_16 = arith.constant 0 : index
    %c0_17 = arith.constant 0 : index
    %19 = vector.load %arg5[%c0_15, %c0_16, %c0_17] : memref<1x32x32xbf16, #tpu.memory_space<vmem>>, vector<1x32x32xbf16>
    %20 = vector.shape_cast %19 : vector<1x32x32xbf16> to vector<32x32xbf16>
    %cst_18 = arith.constant dense<0.000000e+00> : vector<32x32xf32>
    %21 = tpu.matmul %4, %20, %cst_18 {dimension_numbers = #tpu.dot_dimension_numbers<[1], [0], [0], [1], [0, 0, 1, 1], [], []>} : vector<32x32xbf16>, vector<32x32xbf16>, vector<32x32xf32> -> vector<32x32xf32>
    %c0_19 = arith.constant 0 : index
    %c0_20 = arith.constant 0 : index
    %c0_21 = arith.constant 0 : index
    %22 = vector.load %arg8[%c0_19, %c0_20, %c0_21] : memref<1x1x32xf32, #tpu.memory_space<vmem>>, vector<1x1x32xf32>
    %23 = vector.shape_cast %22 : vector<1x1x32xf32> to vector<1x32xf32>
    %24 = vector.broadcast %23 : vector<1x32xf32> to vector<32x32xf32>
    %25 = arith.addf %21, %24 : vector<32x32xf32>
    %c0_22 = arith.constant 0 : index
    %c0_23 = arith.constant 0 : index
    %c0_24 = arith.constant 0 : index
    %26 = vector.load %arg9[%c0_22, %c0_23, %c0_24] : memref<1x32x32xbf16, #tpu.memory_space<vmem>>, vector<1x32x32xbf16>
    %27 = vector.shape_cast %26 : vector<1x32x32xbf16> to vector<32x32xbf16>
    %28 = vector.extract_strided_slice %11 {offsets = [0, 0], sizes = [16, 8], strides = [1, 1]} : vector<32x32xf32> to vector<16x8xf32>
    %29 = arith.truncf %28 : vector<16x8xf32> to vector<16x8xbf16>
    %30 = vector.extract_strided_slice %18 {offsets = [0, 0], sizes = [16, 8], strides = [1, 1]} : vector<32x32xf32> to vector<16x8xf32>
    %31 = arith.truncf %30 : vector<16x8xf32> to vector<16x8xbf16>
    %32 = vector.extract_strided_slice %25 {offsets = [0, 0], sizes = [16, 8], strides = [1, 1]} : vector<32x32xf32> to vector<16x8xf32>
    %33 = arith.truncf %32 : vector<16x8xf32> to vector<16x8xbf16>
    %cst_25 = arith.constant dense<0.000000e+00> : vector<16x16xf32>
    %34 = tpu.matmul %29, %31, %cst_25 {dimension_numbers = #tpu.dot_dimension_numbers<[1], [1], [0], [0], [0, 0, 1, 0], [], []>} : vector<16x8xbf16>, vector<16x8xbf16>, vector<16x16xf32> -> vector<16x16xf32>
    %cst_26 = arith.constant dense<0xFF800000> : vector<16xf32>
    %35 = vector.multi_reduction <maximumf>, %34, %cst_26 [1] : vector<16x16xf32> to vector<16xf32>
    %36 = vector.shape_cast %35 : vector<16xf32> to vector<16x1xf32>
    %37 = vector.broadcast %36 : vector<16x1xf32> to vector<16x16xf32>
    %38 = arith.subf %34, %37 : vector<16x16xf32>
    %39 = math.exp %38 : vector<16x16xf32>
    %cst_27 = arith.constant dense<0.000000e+00> : vector<16xf32>
    %40 = vector.multi_reduction <add>, %39, %cst_27 [1] : vector<16x16xf32> to vector<16xf32>
    %41 = vector.shape_cast %40 : vector<16xf32> to vector<16x1xf32>
    %42 = tpu.reciprocal %41 {approx = true} : vector<16x1xf32> -> vector<16x1xf32>
    %43 = vector.broadcast %42 : vector<16x1xf32> to vector<16x16xf32>
    %44 = arith.mulf %39, %43 : vector<16x16xf32>
    %45 = arith.truncf %44 : vector<16x16xf32> to vector<16x16xbf16>
    %cst_28 = arith.constant dense<0.000000e+00> : vector<16x8xf32>
    %46 = tpu.matmul %45, %33, %cst_28 {dimension_numbers = #tpu.dot_dimension_numbers<[1], [0], [0], [1], [0, 0, 1, 1], [], []>} : vector<16x16xbf16>, vector<16x8xbf16>, vector<16x8xf32> -> vector<16x8xf32>
    %47 = arith.truncf %46 : vector<16x8xf32> to vector<16x8xbf16>
    %48 = vector.extract_strided_slice %27 {offsets = [0, 0], sizes = [8, 32], strides = [1, 1]} : vector<32x32xbf16> to vector<8x32xbf16>
    %cst_29 = arith.constant dense<0.000000e+00> : vector<16x32xf32>
    %49 = tpu.matmul %47, %48, %cst_29 {dimension_numbers = #tpu.dot_dimension_numbers<[1], [0], [0], [1], [0, 0, 1, 1], [], []>} : vector<16x8xbf16>, vector<8x32xbf16>, vector<16x32xf32> -> vector<16x32xf32>
    %50 = vector.extract_strided_slice %11 {offsets = [0, 8], sizes = [16, 8], strides = [1, 1]} : vector<32x32xf32> to vector<16x8xf32>
    %51 = arith.truncf %50 : vector<16x8xf32> to vector<16x8xbf16>
    %52 = vector.extract_strided_slice %18 {offsets = [0, 8], sizes = [16, 8], strides = [1, 1]} : vector<32x32xf32> to vector<16x8xf32>
    %53 = arith.truncf %52 : vector<16x8xf32> to vector<16x8xbf16>
    %54 = vector.extract_strided_slice %25 {offsets = [0, 8], sizes = [16, 8], strides = [1, 1]} : vector<32x32xf32> to vector<16x8xf32>
    %55 = arith.truncf %54 : vector<16x8xf32> to vector<16x8xbf16>
    %cst_30 = arith.constant dense<0.000000e+00> : vector<16x16xf32>
    %56 = tpu.matmul %51, %53, %cst_30 {dimension_numbers = #tpu.dot_dimension_numbers<[1], [1], [0], [0], [0, 0, 1, 0], [], []>} : vector<16x8xbf16>, vector<16x8xbf16>, vector<16x16xf32> -> vector<16x16xf32>
    %cst_31 = arith.constant dense<0xFF800000> : vector<16xf32>
    %57 = vector.multi_reduction <maximumf>, %56, %cst_31 [1] : vector<16x16xf32> to vector<16xf32>
    %58 = vector.shape_cast %57 : vector<16xf32> to vector<16x1xf32>
    %59 = vector.broadcast %58 : vector<16x1xf32> to vector<16x16xf32>
    %60 = arith.subf %56, %59 : vector<16x16xf32>
    %61 = math.exp %60 : vector<16x16xf32>
    %cst_32 = arith.constant dense<0.000000e+00> : vector<16xf32>
    %62 = vector.multi_reduction <add>, %61, %cst_32 [1] : vector<16x16xf32> to vector<16xf32>
    %63 = vector.shape_cast %62 : vector<16xf32> to vector<16x1xf32>
    %64 = tpu.reciprocal %63 {approx = true} : vector<16x1xf32> -> vector<16x1xf32>
    %65 = vector.broadcast %64 : vector<16x1xf32> to vector<16x16xf32>
    %66 = arith.mulf %61, %65 : vector<16x16xf32>
    %67 = arith.truncf %66 : vector<16x16xf32> to vector<16x16xbf16>
    %cst_33 = arith.constant dense<0.000000e+00> : vector<16x8xf32>
    %68 = tpu.matmul %67, %55, %cst_33 {dimension_numbers = #tpu.dot_dimension_numbers<[1], [0], [0], [1], [0, 0, 1, 1], [], []>} : vector<16x16xbf16>, vector<16x8xbf16>, vector<16x8xf32> -> vector<16x8xf32>
    %69 = arith.truncf %68 : vector<16x8xf32> to vector<16x8xbf16>
    %70 = vector.extract_strided_slice %27 {offsets = [8, 0], sizes = [8, 32], strides = [1, 1]} : vector<32x32xbf16> to vector<8x32xbf16>
    %cst_34 = arith.constant dense<0.000000e+00> : vector<16x32xf32>
    %71 = tpu.matmul %69, %70, %cst_34 {dimension_numbers = #tpu.dot_dimension_numbers<[1], [0], [0], [1], [0, 0, 1, 1], [], []>} : vector<16x8xbf16>, vector<8x32xbf16>, vector<16x32xf32> -> vector<16x32xf32>
    %72 = arith.addf %49, %71 : vector<16x32xf32>
    %73 = vector.extract_strided_slice %11 {offsets = [0, 16], sizes = [16, 8], strides = [1, 1]} : vector<32x32xf32> to vector<16x8xf32>
    %74 = arith.truncf %73 : vector<16x8xf32> to vector<16x8xbf16>
    %75 = vector.extract_strided_slice %18 {offsets = [0, 16], sizes = [16, 8], strides = [1, 1]} : vector<32x32xf32> to vector<16x8xf32>
    %76 = arith.truncf %75 : vector<16x8xf32> to vector<16x8xbf16>
    %77 = vector.extract_strided_slice %25 {offsets = [0, 16], sizes = [16, 8], strides = [1, 1]} : vector<32x32xf32> to vector<16x8xf32>
    %78 = arith.truncf %77 : vector<16x8xf32> to vector<16x8xbf16>
    %cst_35 = arith.constant dense<0.000000e+00> : vector<16x16xf32>
    %79 = tpu.matmul %74, %76, %cst_35 {dimension_numbers = #tpu.dot_dimension_numbers<[1], [1], [0], [0], [0, 0, 1, 0], [], []>} : vector<16x8xbf16>, vector<16x8xbf16>, vector<16x16xf32> -> vector<16x16xf32>
    %cst_36 = arith.constant dense<0xFF800000> : vector<16xf32>
    %80 = vector.multi_reduction <maximumf>, %79, %cst_36 [1] : vector<16x16xf32> to vector<16xf32>
    %81 = vector.shape_cast %80 : vector<16xf32> to vector<16x1xf32>
    %82 = vector.broadcast %81 : vector<16x1xf32> to vector<16x16xf32>
    %83 = arith.subf %79, %82 : vector<16x16xf32>
    %84 = math.exp %83 : vector<16x16xf32>
    %cst_37 = arith.constant dense<0.000000e+00> : vector<16xf32>
    %85 = vector.multi_reduction <add>, %84, %cst_37 [1] : vector<16x16xf32> to vector<16xf32>
    %86 = vector.shape_cast %85 : vector<16xf32> to vector<16x1xf32>
    %87 = tpu.reciprocal %86 {approx = true} : vector<16x1xf32> -> vector<16x1xf32>
    %88 = vector.broadcast %87 : vector<16x1xf32> to vector<16x16xf32>
    %89 = arith.mulf %84, %88 : vector<16x16xf32>
    %90 = arith.truncf %89 : vector<16x16xf32> to vector<16x16xbf16>
    %cst_38 = arith.constant dense<0.000000e+00> : vector<16x8xf32>
    %91 = tpu.matmul %90, %78, %cst_38 {dimension_numbers = #tpu.dot_dimension_numbers<[1], [0], [0], [1], [0, 0, 1, 1], [], []>} : vector<16x16xbf16>, vector<16x8xbf16>, vector<16x8xf32> -> vector<16x8xf32>
    %92 = arith.truncf %91 : vector<16x8xf32> to vector<16x8xbf16>
    %93 = vector.extract_strided_slice %27 {offsets = [16, 0], sizes = [8, 32], strides = [1, 1]} : vector<32x32xbf16> to vector<8x32xbf16>
    %cst_39 = arith.constant dense<0.000000e+00> : vector<16x32xf32>
    %94 = tpu.matmul %92, %93, %cst_39 {dimension_numbers = #tpu.dot_dimension_numbers<[1], [0], [0], [1], [0, 0, 1, 1], [], []>} : vector<16x8xbf16>, vector<8x32xbf16>, vector<16x32xf32> -> vector<16x32xf32>
    %95 = arith.addf %72, %94 : vector<16x32xf32>
    %96 = vector.extract_strided_slice %11 {offsets = [0, 24], sizes = [16, 8], strides = [1, 1]} : vector<32x32xf32> to vector<16x8xf32>
    %97 = arith.truncf %96 : vector<16x8xf32> to vector<16x8xbf16>
    %98 = vector.extract_strided_slice %18 {offsets = [0, 24], sizes = [16, 8], strides = [1, 1]} : vector<32x32xf32> to vector<16x8xf32>
    %99 = arith.truncf %98 : vector<16x8xf32> to vector<16x8xbf16>
    %100 = vector.extract_strided_slice %25 {offsets = [0, 24], sizes = [16, 8], strides = [1, 1]} : vector<32x32xf32> to vector<16x8xf32>
    %101 = arith.truncf %100 : vector<16x8xf32> to vector<16x8xbf16>
    %cst_40 = arith.constant dense<0.000000e+00> : vector<16x16xf32>
    %102 = tpu.matmul %97, %99, %cst_40 {dimension_numbers = #tpu.dot_dimension_numbers<[1], [1], [0], [0], [0, 0, 1, 0], [], []>} : vector<16x8xbf16>, vector<16x8xbf16>, vector<16x16xf32> -> vector<16x16xf32>
    %cst_41 = arith.constant dense<0xFF800000> : vector<16xf32>
    %103 = vector.multi_reduction <maximumf>, %102, %cst_41 [1] : vector<16x16xf32> to vector<16xf32>
    %104 = vector.shape_cast %103 : vector<16xf32> to vector<16x1xf32>
    %105 = vector.broadcast %104 : vector<16x1xf32> to vector<16x16xf32>
    %106 = arith.subf %102, %105 : vector<16x16xf32>
    %107 = math.exp %106 : vector<16x16xf32>
    %cst_42 = arith.constant dense<0.000000e+00> : vector<16xf32>
    %108 = vector.multi_reduction <add>, %107, %cst_42 [1] : vector<16x16xf32> to vector<16xf32>
    %109 = vector.shape_cast %108 : vector<16xf32> to vector<16x1xf32>
    %110 = tpu.reciprocal %109 {approx = true} : vector<16x1xf32> -> vector<16x1xf32>
    %111 = vector.broadcast %110 : vector<16x1xf32> to vector<16x16xf32>
    %112 = arith.mulf %107, %111 : vector<16x16xf32>
    %113 = arith.truncf %112 : vector<16x16xf32> to vector<16x16xbf16>
    %cst_43 = arith.constant dense<0.000000e+00> : vector<16x8xf32>
    %114 = tpu.matmul %113, %101, %cst_43 {dimension_numbers = #tpu.dot_dimension_numbers<[1], [0], [0], [1], [0, 0, 1, 1], [], []>} : vector<16x16xbf16>, vector<16x8xbf16>, vector<16x8xf32> -> vector<16x8xf32>
    %115 = arith.truncf %114 : vector<16x8xf32> to vector<16x8xbf16>
    %116 = vector.extract_strided_slice %27 {offsets = [24, 0], sizes = [8, 32], strides = [1, 1]} : vector<32x32xbf16> to vector<8x32xbf16>
    %cst_44 = arith.constant dense<0.000000e+00> : vector<16x32xf32>
    %117 = tpu.matmul %115, %116, %cst_44 {dimension_numbers = #tpu.dot_dimension_numbers<[1], [0], [0], [1], [0, 0, 1, 1], [], []>} : vector<16x8xbf16>, vector<8x32xbf16>, vector<16x32xf32> -> vector<16x32xf32>
    %118 = arith.addf %95, %117 : vector<16x32xf32>
    %119 = vector.extract_strided_slice %11 {offsets = [16, 0], sizes = [16, 8], strides = [1, 1]} : vector<32x32xf32> to vector<16x8xf32>
    %120 = arith.truncf %119 : vector<16x8xf32> to vector<16x8xbf16>
    %121 = vector.extract_strided_slice %18 {offsets = [16, 0], sizes = [16, 8], strides = [1, 1]} : vector<32x32xf32> to vector<16x8xf32>
    %122 = arith.truncf %121 : vector<16x8xf32> to vector<16x8xbf16>
    %123 = vector.extract_strided_slice %25 {offsets = [16, 0], sizes = [16, 8], strides = [1, 1]} : vector<32x32xf32> to vector<16x8xf32>
    %124 = arith.truncf %123 : vector<16x8xf32> to vector<16x8xbf16>
    %cst_45 = arith.constant dense<0.000000e+00> : vector<16x16xf32>
    %125 = tpu.matmul %120, %122, %cst_45 {dimension_numbers = #tpu.dot_dimension_numbers<[1], [1], [0], [0], [0, 0, 1, 0], [], []>} : vector<16x8xbf16>, vector<16x8xbf16>, vector<16x16xf32> -> vector<16x16xf32>
    %cst_46 = arith.constant dense<0xFF800000> : vector<16xf32>
    %126 = vector.multi_reduction <maximumf>, %125, %cst_46 [1] : vector<16x16xf32> to vector<16xf32>
    %127 = vector.shape_cast %126 : vector<16xf32> to vector<16x1xf32>
    %128 = vector.broadcast %127 : vector<16x1xf32> to vector<16x16xf32>
    %129 = arith.subf %125, %128 : vector<16x16xf32>
    %130 = math.exp %129 : vector<16x16xf32>
    %cst_47 = arith.constant dense<0.000000e+00> : vector<16xf32>
    %131 = vector.multi_reduction <add>, %130, %cst_47 [1] : vector<16x16xf32> to vector<16xf32>
    %132 = vector.shape_cast %131 : vector<16xf32> to vector<16x1xf32>
    %133 = tpu.reciprocal %132 {approx = true} : vector<16x1xf32> -> vector<16x1xf32>
    %134 = vector.broadcast %133 : vector<16x1xf32> to vector<16x16xf32>
    %135 = arith.mulf %130, %134 : vector<16x16xf32>
    %136 = arith.truncf %135 : vector<16x16xf32> to vector<16x16xbf16>
    %cst_48 = arith.constant dense<0.000000e+00> : vector<16x8xf32>
    %137 = tpu.matmul %136, %124, %cst_48 {dimension_numbers = #tpu.dot_dimension_numbers<[1], [0], [0], [1], [0, 0, 1, 1], [], []>} : vector<16x16xbf16>, vector<16x8xbf16>, vector<16x8xf32> -> vector<16x8xf32>
    %138 = arith.truncf %137 : vector<16x8xf32> to vector<16x8xbf16>
    %139 = vector.extract_strided_slice %27 {offsets = [0, 0], sizes = [8, 32], strides = [1, 1]} : vector<32x32xbf16> to vector<8x32xbf16>
    %cst_49 = arith.constant dense<0.000000e+00> : vector<16x32xf32>
    %140 = tpu.matmul %138, %139, %cst_49 {dimension_numbers = #tpu.dot_dimension_numbers<[1], [0], [0], [1], [0, 0, 1, 1], [], []>} : vector<16x8xbf16>, vector<8x32xbf16>, vector<16x32xf32> -> vector<16x32xf32>
    %141 = vector.extract_strided_slice %11 {offsets = [16, 8], sizes = [16, 8], strides = [1, 1]} : vector<32x32xf32> to vector<16x8xf32>
    %142 = arith.truncf %141 : vector<16x8xf32> to vector<16x8xbf16>
    %143 = vector.extract_strided_slice %18 {offsets = [16, 8], sizes = [16, 8], strides = [1, 1]} : vector<32x32xf32> to vector<16x8xf32>
    %144 = arith.truncf %143 : vector<16x8xf32> to vector<16x8xbf16>
    %145 = vector.extract_strided_slice %25 {offsets = [16, 8], sizes = [16, 8], strides = [1, 1]} : vector<32x32xf32> to vector<16x8xf32>
    %146 = arith.truncf %145 : vector<16x8xf32> to vector<16x8xbf16>
    %cst_50 = arith.constant dense<0.000000e+00> : vector<16x16xf32>
    %147 = tpu.matmul %142, %144, %cst_50 {dimension_numbers = #tpu.dot_dimension_numbers<[1], [1], [0], [0], [0, 0, 1, 0], [], []>} : vector<16x8xbf16>, vector<16x8xbf16>, vector<16x16xf32> -> vector<16x16xf32>
    %cst_51 = arith.constant dense<0xFF800000> : vector<16xf32>
    %148 = vector.multi_reduction <maximumf>, %147, %cst_51 [1] : vector<16x16xf32> to vector<16xf32>
    %149 = vector.shape_cast %148 : vector<16xf32> to vector<16x1xf32>
    %150 = vector.broadcast %149 : vector<16x1xf32> to vector<16x16xf32>
    %151 = arith.subf %147, %150 : vector<16x16xf32>
    %152 = math.exp %151 : vector<16x16xf32>
    %cst_52 = arith.constant dense<0.000000e+00> : vector<16xf32>
    %153 = vector.multi_reduction <add>, %152, %cst_52 [1] : vector<16x16xf32> to vector<16xf32>
    %154 = vector.shape_cast %153 : vector<16xf32> to vector<16x1xf32>
    %155 = tpu.reciprocal %154 {approx = true} : vector<16x1xf32> -> vector<16x1xf32>
    %156 = vector.broadcast %155 : vector<16x1xf32> to vector<16x16xf32>
    %157 = arith.mulf %152, %156 : vector<16x16xf32>
    %158 = arith.truncf %157 : vector<16x16xf32> to vector<16x16xbf16>
    %cst_53 = arith.constant dense<0.000000e+00> : vector<16x8xf32>
    %159 = tpu.matmul %158, %146, %cst_53 {dimension_numbers = #tpu.dot_dimension_numbers<[1], [0], [0], [1], [0, 0, 1, 1], [], []>} : vector<16x16xbf16>, vector<16x8xbf16>, vector<16x8xf32> -> vector<16x8xf32>
    %160 = arith.truncf %159 : vector<16x8xf32> to vector<16x8xbf16>
    %161 = vector.extract_strided_slice %27 {offsets = [8, 0], sizes = [8, 32], strides = [1, 1]} : vector<32x32xbf16> to vector<8x32xbf16>
    %cst_54 = arith.constant dense<0.000000e+00> : vector<16x32xf32>
    %162 = tpu.matmul %160, %161, %cst_54 {dimension_numbers = #tpu.dot_dimension_numbers<[1], [0], [0], [1], [0, 0, 1, 1], [], []>} : vector<16x8xbf16>, vector<8x32xbf16>, vector<16x32xf32> -> vector<16x32xf32>
    %163 = arith.addf %140, %162 : vector<16x32xf32>
    %164 = vector.extract_strided_slice %11 {offsets = [16, 16], sizes = [16, 8], strides = [1, 1]} : vector<32x32xf32> to vector<16x8xf32>
    %165 = arith.truncf %164 : vector<16x8xf32> to vector<16x8xbf16>
    %166 = vector.extract_strided_slice %18 {offsets = [16, 16], sizes = [16, 8], strides = [1, 1]} : vector<32x32xf32> to vector<16x8xf32>
    %167 = arith.truncf %166 : vector<16x8xf32> to vector<16x8xbf16>
    %168 = vector.extract_strided_slice %25 {offsets = [16, 16], sizes = [16, 8], strides = [1, 1]} : vector<32x32xf32> to vector<16x8xf32>
    %169 = arith.truncf %168 : vector<16x8xf32> to vector<16x8xbf16>
    %cst_55 = arith.constant dense<0.000000e+00> : vector<16x16xf32>
    %170 = tpu.matmul %165, %167, %cst_55 {dimension_numbers = #tpu.dot_dimension_numbers<[1], [1], [0], [0], [0, 0, 1, 0], [], []>} : vector<16x8xbf16>, vector<16x8xbf16>, vector<16x16xf32> -> vector<16x16xf32>
    %cst_56 = arith.constant dense<0xFF800000> : vector<16xf32>
    %171 = vector.multi_reduction <maximumf>, %170, %cst_56 [1] : vector<16x16xf32> to vector<16xf32>
    %172 = vector.shape_cast %171 : vector<16xf32> to vector<16x1xf32>
    %173 = vector.broadcast %172 : vector<16x1xf32> to vector<16x16xf32>
    %174 = arith.subf %170, %173 : vector<16x16xf32>
    %175 = math.exp %174 : vector<16x16xf32>
    %cst_57 = arith.constant dense<0.000000e+00> : vector<16xf32>
    %176 = vector.multi_reduction <add>, %175, %cst_57 [1] : vector<16x16xf32> to vector<16xf32>
    %177 = vector.shape_cast %176 : vector<16xf32> to vector<16x1xf32>
    %178 = tpu.reciprocal %177 {approx = true} : vector<16x1xf32> -> vector<16x1xf32>
    %179 = vector.broadcast %178 : vector<16x1xf32> to vector<16x16xf32>
    %180 = arith.mulf %175, %179 : vector<16x16xf32>
    %181 = arith.truncf %180 : vector<16x16xf32> to vector<16x16xbf16>
    %cst_58 = arith.constant dense<0.000000e+00> : vector<16x8xf32>
    %182 = tpu.matmul %181, %169, %cst_58 {dimension_numbers = #tpu.dot_dimension_numbers<[1], [0], [0], [1], [0, 0, 1, 1], [], []>} : vector<16x16xbf16>, vector<16x8xbf16>, vector<16x8xf32> -> vector<16x8xf32>
    %183 = arith.truncf %182 : vector<16x8xf32> to vector<16x8xbf16>
    %184 = vector.extract_strided_slice %27 {offsets = [16, 0], sizes = [8, 32], strides = [1, 1]} : vector<32x32xbf16> to vector<8x32xbf16>
    %cst_59 = arith.constant dense<0.000000e+00> : vector<16x32xf32>
    %185 = tpu.matmul %183, %184, %cst_59 {dimension_numbers = #tpu.dot_dimension_numbers<[1], [0], [0], [1], [0, 0, 1, 1], [], []>} : vector<16x8xbf16>, vector<8x32xbf16>, vector<16x32xf32> -> vector<16x32xf32>
    %186 = arith.addf %163, %185 : vector<16x32xf32>
    %187 = vector.extract_strided_slice %11 {offsets = [16, 24], sizes = [16, 8], strides = [1, 1]} : vector<32x32xf32> to vector<16x8xf32>
    %188 = arith.truncf %187 : vector<16x8xf32> to vector<16x8xbf16>
    %189 = vector.extract_strided_slice %18 {offsets = [16, 24], sizes = [16, 8], strides = [1, 1]} : vector<32x32xf32> to vector<16x8xf32>
    %190 = arith.truncf %189 : vector<16x8xf32> to vector<16x8xbf16>
    %191 = vector.extract_strided_slice %25 {offsets = [16, 24], sizes = [16, 8], strides = [1, 1]} : vector<32x32xf32> to vector<16x8xf32>
    %192 = arith.truncf %191 : vector<16x8xf32> to vector<16x8xbf16>
    %cst_60 = arith.constant dense<0.000000e+00> : vector<16x16xf32>
    %193 = tpu.matmul %188, %190, %cst_60 {dimension_numbers = #tpu.dot_dimension_numbers<[1], [1], [0], [0], [0, 0, 1, 0], [], []>} : vector<16x8xbf16>, vector<16x8xbf16>, vector<16x16xf32> -> vector<16x16xf32>
    %cst_61 = arith.constant dense<0xFF800000> : vector<16xf32>
    %194 = vector.multi_reduction <maximumf>, %193, %cst_61 [1] : vector<16x16xf32> to vector<16xf32>
    %195 = vector.shape_cast %194 : vector<16xf32> to vector<16x1xf32>
    %196 = vector.broadcast %195 : vector<16x1xf32> to vector<16x16xf32>
    %197 = arith.subf %193, %196 : vector<16x16xf32>
    %198 = math.exp %197 : vector<16x16xf32>
    %cst_62 = arith.constant dense<0.000000e+00> : vector<16xf32>
    %199 = vector.multi_reduction <add>, %198, %cst_62 [1] : vector<16x16xf32> to vector<16xf32>
    %200 = vector.shape_cast %199 : vector<16xf32> to vector<16x1xf32>
    %201 = tpu.reciprocal %200 {approx = true} : vector<16x1xf32> -> vector<16x1xf32>
    %202 = vector.broadcast %201 : vector<16x1xf32> to vector<16x16xf32>
    %203 = arith.mulf %198, %202 : vector<16x16xf32>
    %204 = arith.truncf %203 : vector<16x16xf32> to vector<16x16xbf16>
    %cst_63 = arith.constant dense<0.000000e+00> : vector<16x8xf32>
    %205 = tpu.matmul %204, %192, %cst_63 {dimension_numbers = #tpu.dot_dimension_numbers<[1], [0], [0], [1], [0, 0, 1, 1], [], []>} : vector<16x16xbf16>, vector<16x8xbf16>, vector<16x8xf32> -> vector<16x8xf32>
    %206 = arith.truncf %205 : vector<16x8xf32> to vector<16x8xbf16>
    %207 = vector.extract_strided_slice %27 {offsets = [24, 0], sizes = [8, 32], strides = [1, 1]} : vector<32x32xbf16> to vector<8x32xbf16>
    %cst_64 = arith.constant dense<0.000000e+00> : vector<16x32xf32>
    %208 = tpu.matmul %206, %207, %cst_64 {dimension_numbers = #tpu.dot_dimension_numbers<[1], [0], [0], [1], [0, 0, 1, 1], [], []>} : vector<16x8xbf16>, vector<8x32xbf16>, vector<16x32xf32> -> vector<16x32xf32>
    %209 = arith.addf %186, %208 : vector<16x32xf32>
    %210 = tpu.concatenate %118, %209 in 0 : vector<16x32xf32>, vector<16x32xf32> -> vector<32x32xf32>
    %c0_65 = arith.constant 0 : index
    %c0_66 = arith.constant 0 : index
    %c0_67 = arith.constant 0 : index
    %211 = vector.load %arg10[%c0_65, %c0_66, %c0_67] : memref<1x1x32xf32, #tpu.memory_space<vmem>>, vector<1x1x32xf32>
    %212 = vector.shape_cast %211 : vector<1x1x32xf32> to vector<1x32xf32>
    %213 = vector.broadcast %212 : vector<1x32xf32> to vector<32x32xf32>
    %214 = arith.addf %210, %213 : vector<32x32xf32>
    %215 = arith.addf %3, %214 : vector<32x32xf32>
    %cst_68 = arith.constant dense<0.000000e+00> : vector<32xf32>
    %216 = vector.multi_reduction <add>, %215, %cst_68 [1] : vector<32x32xf32> to vector<32xf32>
    %217 = vector.shape_cast %216 : vector<32xf32> to vector<32x1xf32>
    %cst_69 = arith.constant 3.200000e+01 : f32
    %218 = vector.broadcast %cst_69 : f32 to vector<32x1xf32>
    %219 = arith.divf %217, %218 : vector<32x1xf32>
    %220 = vector.broadcast %219 : vector<32x1xf32> to vector<32x32xf32>
    %221 = arith.subf %215, %220 : vector<32x32xf32>
    %222 = arith.mulf %221, %221 : vector<32x32xf32>
    %cst_70 = arith.constant dense<0.000000e+00> : vector<32xf32>
    %223 = vector.multi_reduction <add>, %222, %cst_70 [1] : vector<32x32xf32> to vector<32xf32>
    %224 = vector.shape_cast %223 : vector<32xf32> to vector<32x1xf32>
    %cst_71 = arith.constant 3.200000e+01 : f32
    %225 = vector.broadcast %cst_71 : f32 to vector<32x1xf32>
    %226 = arith.divf %224, %225 : vector<32x1xf32>
    %227 = vector.broadcast %219 : vector<32x1xf32> to vector<32x32xf32>
    %228 = arith.subf %215, %227 : vector<32x32xf32>
    %cst_72 = arith.constant 9.99999974E-6 : f32
    %229 = vector.broadcast %cst_72 : f32 to vector<32x1xf32>
    %230 = arith.addf %226, %229 : vector<32x1xf32>
    %231 = math.rsqrt %230 : vector<32x1xf32>
    %232 = vector.broadcast %231 : vector<32x1xf32> to vector<32x32xf32>
    %233 = arith.mulf %228, %232 : vector<32x32xf32>
    %c0_73 = arith.constant 0 : index
    %c0_74 = arith.constant 0 : index
    %c0_75 = arith.constant 0 : index
    %234 = vector.load %arg11[%c0_73, %c0_74, %c0_75] : memref<1x1x32xf32, #tpu.memory_space<vmem>>, vector<1x1x32xf32>
    %235 = vector.shape_cast %234 : vector<1x1x32xf32> to vector<1x32xf32>
    %236 = vector.broadcast %235 : vector<1x32xf32> to vector<32x32xf32>
    %237 = arith.mulf %233, %236 : vector<32x32xf32>
    %c0_76 = arith.constant 0 : index
    %c0_77 = arith.constant 0 : index
    %c0_78 = arith.constant 0 : index
    %238 = vector.load %arg12[%c0_76, %c0_77, %c0_78] : memref<1x1x32xf32, #tpu.memory_space<vmem>>, vector<1x1x32xf32>
    %239 = vector.shape_cast %238 : vector<1x1x32xf32> to vector<1x32xf32>
    %240 = vector.broadcast %239 : vector<1x32xf32> to vector<32x32xf32>
    %241 = arith.addf %237, %240 : vector<32x32xf32>
    %242 = arith.truncf %241 : vector<32x32xf32> to vector<32x32xbf16>
    %c0_79 = arith.constant 0 : index
    %c0_80 = arith.constant 0 : index
    %c0_81 = arith.constant 0 : index
    %243 = vector.load %arg13[%c0_79, %c0_80, %c0_81] : memref<1x32x128xbf16, #tpu.memory_space<vmem>>, vector<1x32x128xbf16>
    %244 = vector.shape_cast %243 : vector<1x32x128xbf16> to vector<32x128xbf16>
    %cst_82 = arith.constant dense<0.000000e+00> : vector<32x128xf32>
    %245 = tpu.matmul %242, %244, %cst_82 {dimension_numbers = #tpu.dot_dimension_numbers<[1], [0], [0], [1], [0, 0, 1, 1], [], []>} : vector<32x32xbf16>, vector<32x128xbf16>, vector<32x128xf32> -> vector<32x128xf32>
    %c0_83 = arith.constant 0 : index
    %c0_84 = arith.constant 0 : index
    %c0_85 = arith.constant 0 : index
    %246 = vector.load %arg14[%c0_83, %c0_84, %c0_85] : memref<1x1x128xf32, #tpu.memory_space<vmem>>, vector<1x1x128xf32>
    %247 = vector.shape_cast %246 : vector<1x1x128xf32> to vector<1x128xf32>
    %248 = vector.broadcast %247 : vector<1x128xf32> to vector<32x128xf32>
    %249 = arith.addf %245, %248 : vector<32x128xf32>
    %cst_86 = arith.constant 0.000000e+00 : f32
    %250 = vector.broadcast %cst_86 : f32 to vector<32x128xf32>
    %251 = arith.maximumf %249, %250 : vector<32x128xf32>
    %252 = arith.truncf %251 : vector<32x128xf32> to vector<32x128xbf16>
    %c0_87 = arith.constant 0 : index
    %c0_88 = arith.constant 0 : index
    %c0_89 = arith.constant 0 : index
    %253 = vector.load %arg15[%c0_87, %c0_88, %c0_89] : memref<1x128x32xbf16, #tpu.memory_space<vmem>>, vector<1x128x32xbf16>
    %254 = vector.shape_cast %253 : vector<1x128x32xbf16> to vector<128x32xbf16>
    %cst_90 = arith.constant dense<0.000000e+00> : vector<32x32xf32>
    %255 = tpu.matmul %252, %254, %cst_90 {dimension_numbers = #tpu.dot_dimension_numbers<[1], [0], [0], [1], [0, 0, 1, 1], [], []>} : vector<32x128xbf16>, vector<128x32xbf16>, vector<32x32xf32> -> vector<32x32xf32>
    %c0_91 = arith.constant 0 : index
    %c0_92 = arith.constant 0 : index
    %c0_93 = arith.constant 0 : index
    %256 = vector.load %arg16[%c0_91, %c0_92, %c0_93] : memref<1x1x32xf32, #tpu.memory_space<vmem>>, vector<1x1x32xf32>
    %257 = vector.shape_cast %256 : vector<1x1x32xf32> to vector<1x32xf32>
    %258 = vector.broadcast %257 : vector<1x32xf32> to vector<32x32xf32>
    %259 = arith.addf %255, %258 : vector<32x32xf32>
    %260 = arith.addf %241, %259 : vector<32x32xf32>
    %cst_94 = arith.constant dense<0.000000e+00> : vector<32xf32>
    %261 = vector.multi_reduction <add>, %260, %cst_94 [1] : vector<32x32xf32> to vector<32xf32>
    %262 = vector.shape_cast %261 : vector<32xf32> to vector<32x1xf32>
    %cst_95 = arith.constant 3.200000e+01 : f32
    %263 = vector.broadcast %cst_95 : f32 to vector<32x1xf32>
    %264 = arith.divf %262, %263 : vector<32x1xf32>
    %265 = vector.broadcast %264 : vector<32x1xf32> to vector<32x32xf32>
    %266 = arith.subf %260, %265 : vector<32x32xf32>
    %267 = arith.mulf %266, %266 : vector<32x32xf32>
    %cst_96 = arith.constant dense<0.000000e+00> : vector<32xf32>
    %268 = vector.multi_reduction <add>, %267, %cst_96 [1] : vector<32x32xf32> to vector<32xf32>
    %269 = vector.shape_cast %268 : vector<32xf32> to vector<32x1xf32>
    %cst_97 = arith.constant 3.200000e+01 : f32
    %270 = vector.broadcast %cst_97 : f32 to vector<32x1xf32>
    %271 = arith.divf %269, %270 : vector<32x1xf32>
    %272 = vector.broadcast %264 : vector<32x1xf32> to vector<32x32xf32>
    %273 = arith.subf %260, %272 : vector<32x32xf32>
    %cst_98 = arith.constant 9.99999974E-6 : f32
    %274 = vector.broadcast %cst_98 : f32 to vector<32x1xf32>
    %275 = arith.addf %271, %274 : vector<32x1xf32>
    %276 = math.rsqrt %275 : vector<32x1xf32>
    %277 = vector.broadcast %276 : vector<32x1xf32> to vector<32x32xf32>
    %278 = arith.mulf %273, %277 : vector<32x32xf32>
    %c0_99 = arith.constant 0 : index
    %c0_100 = arith.constant 0 : index
    %c0_101 = arith.constant 0 : index
    %279 = vector.load %arg17[%c0_99, %c0_100, %c0_101] : memref<1x1x32xf32, #tpu.memory_space<vmem>>, vector<1x1x32xf32>
    %280 = vector.shape_cast %279 : vector<1x1x32xf32> to vector<1x32xf32>
    %281 = vector.broadcast %280 : vector<1x32xf32> to vector<32x32xf32>
    %282 = arith.mulf %278, %281 : vector<32x32xf32>
    %c0_102 = arith.constant 0 : index
    %c0_103 = arith.constant 0 : index
    %c0_104 = arith.constant 0 : index
    %283 = vector.load %arg18[%c0_102, %c0_103, %c0_104] : memref<1x1x32xf32, #tpu.memory_space<vmem>>, vector<1x1x32xf32>
    %284 = vector.shape_cast %283 : vector<1x1x32xf32> to vector<1x32xf32>
    %285 = vector.broadcast %284 : vector<1x32xf32> to vector<32x32xf32>
    %286 = arith.addf %282, %285 : vector<32x32xf32>
    %c0_105 = arith.constant 0 : index
    %c0_106 = arith.constant 0 : index
    %287 = vector.load %arg23[%c0_105, %c0_106] : memref<32x32xf32, #tpu.memory_space<vmem>>, vector<32x32xf32>
    tpu.vector_store %arg23[%c0_105, %c0_106], %286 {strides = array<i32>} : memref<32x32xf32, #tpu.memory_space<vmem>>, vector<32x32xf32>,
    %c1_i32 = arith.constant 1 : i32
    %288 = arith.cmpi eq, %arg1, %c1_i32 : i32
    %289 = arith.extui %288 : i1 to i32
    %c0_i32_107 = arith.constant 0 : i32
    %290 = arith.cmpi ne, %289, %c0_i32_107 : i32
    scf.if %290 {
      %291 = vector.extract_strided_slice %286 {offsets = [0, 0], sizes = [16, 32], strides = [1, 1]} : vector<32x32xf32> to vector<16x32xf32>
      %cst_108 = arith.constant dense<0.000000e+00> : vector<32xf32>
      %292 = vector.multi_reduction <add>, %291, %cst_108 [0] : vector<16x32xf32> to vector<32xf32>
      %293 = vector.shape_cast %292 : vector<32xf32> to vector<1x32xf32>
      %cst_109 = arith.constant 1.600000e+01 : f32
      %294 = vector.broadcast %cst_109 : f32 to vector<1x32xf32>
      %295 = arith.divf %293, %294 : vector<1x32xf32>
      %296 = vector.extract_strided_slice %286 {offsets = [16, 0], sizes = [16, 32], strides = [1, 1]} : vector<32x32xf32> to vector<16x32xf32>
      %cst_110 = arith.constant dense<0.000000e+00> : vector<32xf32>
      %297 = vector.multi_reduction <add>, %296, %cst_110 [0] : vector<16x32xf32> to vector<32xf32>
      %298 = vector.shape_cast %297 : vector<32xf32> to vector<1x32xf32>
      %cst_111 = arith.constant 1.600000e+01 : f32
      %299 = vector.broadcast %cst_111 : f32 to vector<1x32xf32>
      %300 = arith.divf %298, %299 : vector<1x32xf32>
      %301 = tpu.concatenate %295, %300 in 0 : vector<1x32xf32>, vector<1x32xf32> -> vector<2x32xf32>
      %c0_112 = arith.constant 0 : index
      %c0_113 = arith.constant 0 : index
      %302 = vector.load %arg24[%c0_112, %c0_113] : memref<2x32xf32, #tpu.memory_space<vmem>>, vector<2x32xf32>
      tpu.vector_store %arg24[%c0_112, %c0_113], %301 {strides = array<i32>} : memref<2x32xf32, #tpu.memory_space<vmem>>, vector<2x32xf32>,
      %c0_114 = arith.constant 0 : index
      %c0_115 = arith.constant 0 : index
      %303 = vector.load %arg19[%c0_114, %c0_115] : memref<32x2xf32, #tpu.memory_space<vmem>>, vector<32x2xf32>
      %cst_116 = arith.constant dense<0.000000e+00> : vector<2x2xf32>
      %304 = tpu.matmul %301, %303, %cst_116 {dimension_numbers = #tpu.dot_dimension_numbers<[1], [0], [0], [1], [0, 0, 1, 1], [], []>} : vector<2x32xf32>, vector<32x2xf32>, vector<2x2xf32> -> vector<2x2xf32>
      %c0_117 = arith.constant 0 : index
      %c0_118 = arith.constant 0 : index
      %305 = vector.load %arg20[%c0_117, %c0_118] : memref<1x2xf32, #tpu.memory_space<vmem>>, vector<1x2xf32>
      %306 = vector.broadcast %305 : vector<1x2xf32> to vector<2x2xf32>
      %307 = arith.addf %304, %306 : vector<2x2xf32>
      %c0_119 = arith.constant 0 : index
      %c0_120 = arith.constant 0 : index
      %308 = vector.load %arg25[%c0_119, %c0_120] : memref<2x2xf32, #tpu.memory_space<vmem>>, vector<2x2xf32>
      tpu.vector_store %arg25[%c0_119, %c0_120], %307 {strides = array<i32>} : memref<2x2xf32, #tpu.memory_space<vmem>>, vector<2x2xf32>,
      %c0_121 = arith.constant 0 : index
      %c0_122 = arith.constant 0 : index
      %309 = vector.load %arg21[%c0_121, %c0_122] : memref<32x1xf32, #tpu.memory_space<vmem>>, vector<32x1xf32>
      %cst_123 = arith.constant dense<0.000000e+00> : vector<2x1xf32>
      %310 = tpu.matmul %301, %309, %cst_123 {dimension_numbers = #tpu.dot_dimension_numbers<[1], [0], [0], [1], [0, 0, 1, 1], [], []>} : vector<2x32xf32>, vector<32x1xf32>, vector<2x1xf32> -> vector<2x1xf32>
      %c0_124 = arith.constant 0 : index
      %c0_125 = arith.constant 0 : index
      %311 = vector.load %arg22[%c0_124, %c0_125] : memref<1x1xf32, #tpu.memory_space<vmem>>, vector<1x1xf32>
      %312 = vector.broadcast %311 : vector<1x1xf32> to vector<2x1xf32>
      %313 = arith.addf %310, %312 : vector<2x1xf32>
      %cst_126 = arith.constant 0.000000e+00 : f32
      %314 = vector.broadcast %cst_126 : f32 to vector<2x1xf32>
      %315 = arith.subf %314, %313 : vector<2x1xf32>
      %316 = math.exp %315 : vector<2x1xf32>
      %cst_127 = arith.constant 1.000000e+00 : f32
      %317 = vector.broadcast %cst_127 : f32 to vector<2x1xf32>
      %318 = arith.addf %317, %316 : vector<2x1xf32>
      %cst_128 = arith.constant 1.000000e+00 : f32
      %319 = vector.broadcast %cst_128 : f32 to vector<2x1xf32>
      %320 = arith.divf %319, %318 : vector<2x1xf32>
      %c0_129 = arith.constant 0 : index
      %c0_130 = arith.constant 0 : index
      %321 = vector.load %arg26[%c0_129, %c0_130] : memref<2x1xf32, #tpu.memory_space<vmem>>, vector<2x1xf32>
      tpu.vector_store %arg26[%c0_129, %c0_130], %320 {strides = array<i32>} : memref<2x1xf32, #tpu.memory_space<vmem>>, vector<2x1xf32>,
    } else {
    }
    return
  }
  func.func @transform_1(%arg0: i32, %arg1: i32) -> (i32, i32, i32) {
    %c0_i32 = arith.constant 0 : i32
    %c0_i32_0 = arith.constant 0 : i32
    %c0_i32_1 = arith.constant 0 : i32
    return %arg1, %c0_i32, %c0_i32_0 : i32, i32, i32
  }
  func.func @transform_2(%arg0: i32, %arg1: i32) -> (i32, i32, i32) {
    %c0_i32 = arith.constant 0 : i32
    %c0_i32_0 = arith.constant 0 : i32
    %c0_i32_1 = arith.constant 0 : i32
    return %arg1, %c0_i32, %c0_i32_0 : i32, i32, i32
  }
  func.func @transform_3(%arg0: i32, %arg1: i32) -> (i32, i32, i32) {
    %c0_i32 = arith.constant 0 : i32
    %c0_i32_0 = arith.constant 0 : i32
    %c0_i32_1 = arith.constant 0 : i32
    return %arg1, %c0_i32, %c0_i32_0 : i32, i32, i32
  }
  func.func @transform_4(%arg0: i32, %arg1: i32) -> (i32, i32, i32) {
    %c0_i32 = arith.constant 0 : i32
    %c0_i32_0 = arith.constant 0 : i32
    %c0_i32_1 = arith.constant 0 : i32
    return %arg1, %c0_i32, %c0_i32_0 : i32, i32, i32
  }
  func.func @transform_5(%arg0: i32, %arg1: i32) -> (i32, i32, i32) {
    %c0_i32 = arith.constant 0 : i32
    %c0_i32_0 = arith.constant 0 : i32
    %c0_i32_1 = arith.constant 0 : i32
    return %arg1, %c0_i32, %c0_i32_0 : i32, i32, i32
  }
  func.func @transform_6(%arg0: i32, %arg1: i32) -> (i32, i32, i32) {
    %c0_i32 = arith.constant 0 : i32
    %c0_i32_0 = arith.constant 0 : i32
    %c0_i32_1 = arith.constant 0 : i32
    return %arg1, %c0_i32, %c0_i32_0 : i32, i32, i32
  }
  func.func @transform_7(%arg0: i32, %arg1: i32) -> (i32, i32, i32) {
    %c0_i32 = arith.constant 0 : i32
    %c0_i32_0 = arith.constant 0 : i32
    %c0_i32_1 = arith.constant 0 : i32
    return %arg1, %c0_i32, %c0_i32_0 : i32, i32, i32
  }
  func.func @transform_8(%arg0: i32, %arg1: i32) -> (i32, i32, i32) {
    %c0_i32 = arith.constant 0 : i32
    %c0_i32_0 = arith.constant 0 : i32
    %c0_i32_1 = arith.constant 0 : i32
    return %arg1, %c0_i32, %c0_i32_0 : i32, i32, i32
  }
  func.func @transform_9(%arg0: i32, %arg1: i32) -> (i32, i32, i32) {
    %c0_i32 = arith.constant 0 : i32
    %c0_i32_0 = arith.constant 0 : i32
    %c0_i32_1 = arith.constant 0 : i32
    return %arg1, %c0_i32, %c0_i32_0 : i32, i32, i32
  }
  func.func @transform_10(%arg0: i32, %arg1: i32) -> (i32, i32, i32) {
    %c0_i32 = arith.constant 0 : i32
    %c0_i32_0 = arith.constant 0 : i32
    %c0_i32_1 = arith.constant 0 : i32
    return %arg1, %c0_i32, %c0_i32_0 : i32, i32, i32
  }
  func.func @transform_11(%arg0: i32, %arg1: i32) -> (i32, i32, i32) {
    %c0_i32 = arith.constant 0 : i32
    %c0_i32_0 = arith.constant 0 : i32
    %c0_i32_1 = arith.constant 0 : i32
    return %arg1, %c0_i32, %c0_i32_0 : i32, i32, i32
  }
  func.func @transform_12(%arg0: i32, %arg1: i32) -> (i32, i32, i32) {
    %c0_i32 = arith.constant 0 : i32
    %c0_i32_0 = arith.constant 0 : i32
    %c0_i32_1 = arith.constant 0 : i32
    return %arg1, %c0_i32, %c0_i32_0 : i32, i32, i32
  }
  func.func @transform_13(%arg0: i32, %arg1: i32) -> (i32, i32, i32) {
    %c0_i32 = arith.constant 0 : i32
    %c0_i32_0 = arith.constant 0 : i32
    %c0_i32_1 = arith.constant 0 : i32
    return %arg1, %c0_i32, %c0_i32_0 : i32, i32, i32
  }
  func.func @transform_14(%arg0: i32, %arg1: i32) -> (i32, i32, i32) {
    %c0_i32 = arith.constant 0 : i32
    %c0_i32_0 = arith.constant 0 : i32
    %c0_i32_1 = arith.constant 0 : i32
    return %arg1, %c0_i32, %c0_i32_0 : i32, i32, i32
  }
  func.func @transform_15(%arg0: i32, %arg1: i32) -> (i32, i32, i32) {
    %c0_i32 = arith.constant 0 : i32
    %c0_i32_0 = arith.constant 0 : i32
    %c0_i32_1 = arith.constant 0 : i32
    return %arg1, %c0_i32, %c0_i32_0 : i32, i32, i32
  }
  func.func @transform_16(%arg0: i32, %arg1: i32) -> (i32, i32, i32) {
    %c0_i32 = arith.constant 0 : i32
    %c0_i32_0 = arith.constant 0 : i32
    %c0_i32_1 = arith.constant 0 : i32
    return %arg1, %c0_i32, %c0_i32_0 : i32, i32, i32
  }
  func.func @transform_17(%arg0: i32, %arg1: i32) -> (i32, i32) {
    %c0_i32 = arith.constant 0 : i32
    %c0_i32_0 = arith.constant 0 : i32
    %c0_i32_1 = arith.constant 0 : i32
    return %c0_i32, %c0_i32_0 : i32, i32
  }
  func.func @transform_18(%arg0: i32, %arg1: i32) -> (i32, i32) {
    %c0_i32 = arith.constant 0 : i32
    %c0_i32_0 = arith.constant 0 : i32
    %c0_i32_1 = arith.constant 0 : i32
    return %c0_i32, %c0_i32_0 : i32, i32
  }
  func.func @transform_19(%arg0: i32, %arg1: i32) -> (i32, i32) {
    %c0_i32 = arith.constant 0 : i32
    %c0_i32_0 = arith.constant 0 : i32
    %c0_i32_1 = arith.constant 0 : i32
    return %c0_i32, %c0_i32_0 : i32, i32
  }
  func.func @transform_20(%arg0: i32, %arg1: i32) -> (i32, i32) {
    %c0_i32 = arith.constant 0 : i32
    %c0_i32_0 = arith.constant 0 : i32
    %c0_i32_1 = arith.constant 0 : i32
    return %c0_i32, %c0_i32_0 : i32, i32
  }
  func.func @transform_21(%arg0: i32, %arg1: i32) -> (i32, i32) {
    %c0_i32 = arith.constant 0 : i32
    %c0_i32_0 = arith.constant 0 : i32
    return %arg0, %c0_i32 : i32, i32
  }
  func.func @transform_22(%arg0: i32, %arg1: i32) -> (i32, i32) {
    %c0_i32 = arith.constant 0 : i32
    %c0_i32_0 = arith.constant 0 : i32
    return %arg0, %c0_i32 : i32, i32
  }
  func.func @transform_23(%arg0: i32, %arg1: i32) -> (i32, i32) {
    %c0_i32 = arith.constant 0 : i32
    %c0_i32_0 = arith.constant 0 : i32
    return %arg0, %c0_i32 : i32, i32
  }
  func.func @transform_24(%arg0: i32, %arg1: i32) -> (i32, i32) {
    %c0_i32 = arith.constant 0 : i32
    %c0_i32_0 = arith.constant 0 : i32
    return %arg0, %c0_i32 : i32, i32
  }
}

</mosaic_0001>

<bundles_post_ra>
// kernel: genomics_transformer_forward.1
= control target key start
LH: loop header
LB: loop body
LE: loop exit
PB: predicated region body
PF: predicated region fallthrough
CT: control target
= control target key end

     0   :  { %s3731_s0 = inlined_call_operand.vmem [shape: f32[32,32], index: 0, kind: input, shape index: {}, may-alias: {0,21}]   ;;  %s3732_s1 = inlined_call_operand.vmem [shape: bf16[2,32,32], index: 1, kind: input, shape index: {}]   ;;  %s3733_s2 = inlined_call_operand.vmem [shape: bf16[2,32,32], index: 2, kind: input, shape index: {}]   ;;  %s3734_s3 = inlined_call_operand.vmem [shape: bf16[2,32,32], index: 3, kind: input, shape index: {}]   ;;  %s3735_s4 = inlined_call_operand.vmem [shape: f32[2,1,32], index: 4, kind: input, shape index: {}]   ;;  %s3736_s5 = inlined_call_operand.vmem [shape: f32[2,1,32], index: 5, kind: input, shape index: {}]   ;;  %s3737_s6 = inlined_call_operand.vmem [shape: f32[2,1,32], index: 6, kind: input, shape index: {}]   ;;  %s3738_s7 = inlined_call_operand.vmem [shape: bf16[2,32,32], index: 7, kind: input, shape index: {}]   ;;  %s3739_s8 = inlined_call_operand.vmem [shape: f32[2,1,32], index: 8, kind: input, shape index: {}]   ;;  %s3740_s9 = inlined_call_operand.vmem [shape: f32[2,1,32], index: 9, kind: input, shape index: {}]   ;;  %s3741_s10 = inlined_call_operand.vmem [shape: f32[2,1,32], index: 10, kind: input, shape index: {}]   ;;  %s3742_s11 = inlined_call_operand.vmem [shape: bf16[2,32,128], index: 11, kind: input, shape index: {}]   ;;  %s3743_s12 = inlined_call_operand.vmem [shape: f32[2,1,128], index: 12, kind: input, shape index: {}]   ;;  %s3744_s13 = inlined_call_operand.vmem [shape: bf16[2,128,32], index: 13, kind: input, shape index: {}]   ;;  %s3745_s14 = inlined_call_operand.vmem [shape: f32[2,1,32], index: 14, kind: input, shape index: {}]   ;;  %s3746_s15 = inlined_call_operand.vmem [shape: f32[2,1,32], index: 15, kind: input, shape index: {}]   ;;  %s3747_s16 = inlined_call_operand.vmem [shape: f32[2,1,32], index: 16, kind: input, shape index: {}]   ;;  %s3748_s17 = inlined_call_operand.vmem [shape: f32[32,2], index: 17, kind: input, shape index: {}]   ;;  %s3749_s18 = inlined_call_operand.vmem [shape: f32[1,2], index: 18, kind: input, shape index: {}]   ;;  %s3750_s19 = inlined_call_operand.vmem [shape: f32[32,1], index: 19, kind: input, shape index: {}]   ;;  %s3751_s20 = inlined_call_operand.<no memory space> [shape: f32[1,1], index: 20, kind: input, shape index: {}]   ;;  %s3752_s21 = inlined_call_operand.vmem [shape: f32[32,32], index: 21, kind: output, shape index: {0}, may-alias: {0,21}]   ;;  %s3753_s22 = inlined_call_operand.hbm [shape: f32[2,32], index: 22, kind: output, shape index: {1}]   ;;  %s3754_s23 = inlined_call_operand.hbm [shape: f32[2,2], index: 23, kind: output, shape index: {2}]   ;;  %s3755_s24 = inlined_call_operand.vmem [shape: f32[2,1], index: 24, kind: output, shape index: {3}]  }
   0x1   :  { %3766 = sst [smem:[#allocation18_spill]] %s3731_s0  ;;  %v30_v0 = vstv %s3751_s20 }
   0x2   :  { %3767 = sst [smem:[#allocation19_spill]] %s3732_s1  ;;  %31 = vst [vmem:[#allocation3] sm:$0x1] %v30_v0 }
   0x3   :  { %3768 = sst [smem:[#allocation20_spill]] %s3733_s2 }
   0x4   :  { %3769 = sst [smem:[#allocation21_spill]] %s3734_s3 }
   0x5   :  { %3770 = sst [smem:[#allocation22_spill]] %s3735_s4 }
   0x6   :  { %3771 = sst [smem:[#allocation23_spill]] %s3736_s5 }
   0x7   :  { %3772 = sst [smem:[#allocation24_spill]] %s3737_s6 }
   0x8   :  { %3773 = sst [smem:[#allocation25_spill]] %s3738_s7 }
   0x9   :  { %3774 = sst [smem:[#allocation26_spill]] %s3739_s8 }
   0xa   :  { %3775 = sst [smem:[#allocation27_spill]] %s3748_s17 }
   0xb   :  { %3776 = sst [smem:[#allocation28_spill]] %s3749_s18 }
   0xc   :  { %3777 = sst [smem:[#allocation29_spill]] %s3750_s19 }
   0xd   :  { %3778 = sst [smem:[#allocation30_spill]] %s3752_s21 }
   0xe   :  { %3779 = sst [smem:[#allocation31_spill]] %s3753_s22 }
   0xf   :  { %3780 = sst [smem:[#allocation32_spill]] %s3754_s23 }
  0x10   :  { %3781 = sst [smem:[#allocation33_spill]] %s3755_s24 }
  0x11   :  { %32 = vsyncpa [#allocation5], 0 }
  0x12   :  { %33 = vsyncpa [#allocation7], 0  ;;  %s3171_s27 = smov 0   ;;  %s3173_s28 = smov 0  }
  0x13   :  { %s3175_s6 = smov 0  }
  0x14 LB: > { %3782 = sst [smem:[#allocation12_spill]] %s3030_s28  ;;  %s48_s2 = sadd.s32 1, %s3030_s28  ;;  %s3034_s6 = sphi %s3175_s6, %s39_s6   ;;  %s3030_s28 = sphi %s3173_s28, %s3823_s28   ;;  %s3026_s27 = sphi %s3171_s27, %s3822_s27  }
  0x15   : > { %3783 = sst [smem:[#allocation13_spill]] %s3034_s6  ;;  %p49_p0 = scmp.ge.s32.totalorder %s48_s2, 2 }
  0x16   : > { %p2658_p1 = scmp.ge.s32.totalorder %s3034_s6, 1  ;;  %p791_p2 = scmp.lt.s32.totalorder %s3034_s6, 3 }
  0x17   : > { %s3825_s2 = smov (%p49_p0, %s48_s2), 0 }
  0x18   : > { %3784 = sst [smem:[#allocation14_spill]] %s3825_s2  ;;  %p792_p3 = pnand %p2658_p1, %p791_p2 }
  0x1a   : > { %795 = sbr.rel (%p792_p3) target bundleno = 3231 (0xc9f), region = 100 }
  0x1f   : > { %p914_p4 = scmp.lt.s32.totalorder %s3026_s27, 1  ;;  %s3786_s1 = sld [smem:[#allocation19_spill]] }
  0x20   : > { %s3788_s2 = sld [smem:[#allocation20_spill]]  ;;  %p2671_p5 = scmp.ne.s32.totalorder %s3026_s27, 0 }
  0x21   : > { %s3194_s29 = scalar_select %p914_p4, %s3026_s27, 1 }
  0x22   : > { %s3790_s6 = sld [smem:[#allocation21_spill]] }
  0x23   : > { %s2781_s0 = sshll.u32 %s3194_s29, 4  ;;  %s3792_s30 = sld [smem:[#allocation23_spill]] }
  0x24   : > { %s3793_s8 = sld [smem:[#allocation24_spill]]  ;;  %s3244_s25 = scalar_lea.vmem %s3742_s11, %s2781_s0 }
  0x25   : > { %s3204_s5 = scalar_lea.vmem %s3786_s1, %s2781_s0  ;;  %s3795_s26 = sld [smem:[#allocation26_spill]] }
  0x26   : > { %3787 = sst [smem:[#allocation15_spill]] %s3204_s5  ;;  %s3209_s28 = scalar_lea.vmem %s3788_s2, %s2781_s0 }
  0x27   : > { %3789 = sst [smem:[#allocation16_spill]] %s3209_s28  ;;  %s2786_s1 = sshll.u32 %s3194_s29, 6 }
  0x28   : > { %s3214_s24 = scalar_lea.vmem %s3790_s6, %s2781_s0  ;;  %s3794_s5 = sld [smem:[#allocation25_spill]] }
  0x29   : > { %3791 = sst [smem:[#allocation17_spill]] %s3214_s24  ;;  %s934_s3 = scalar_lea.vmem %s3792_s30, %s3194_s29 }
  0x2a   : > { %s937_s4 = scalar_lea.vmem %s3793_s8, %s3194_s29  ;;  %s959_s8 = scalar_lea.vmem %s3743_s12, %s3194_s29 }
  0x2b   : > { %s945_s28 = scalar_lea.vmem %s3795_s26, %s3194_s29  ;;  %s3254_s26 = scalar_lea.vmem %s3744_s13, %s2786_s1 }
  0x2c   : > { %988 = sbr.rel (%p2671_p5) target bundleno = 65 (0x41), region = 104  ;;  %s3796_s20 = sld [smem:[#allocation18_spill]] (!%p2671_p5) }
  0x2d   : > { %s3797_s30 = sld [smem:[#allocation30_spill]] (!%p2671_p5) }
  0x2e   : > { %s3227_s21 = scalar_lea.vmem %s3794_s5, %s2781_s0 }
  0x32   : > { %v1001_v1 = vld [vmem:[%s3796_s20] sm:$0xff]  ;;  %v1003_v2 = vld [vmem:[%s3796_s20 + $0x8] sm:$0xff]  ;;  %v1005_v3 = vld [vmem:[%s3796_s20 + $0x10] sm:$0xff] }
  0x33   : > { %1002 = vst [vmem:[%s3797_s30] sm:$0xff] %v1001_v1 }
  0x3a   : > { %v1007_v4 = vld [vmem:[%s3796_s20 + $0x18] sm:$0xff] }
  0x3b   : > { %1004 = vst [vmem:[%s3797_s30 + $0x8] sm:$0xff] %v1003_v2 }
  0x3c   : > { %1006 = vst [vmem:[%s3797_s30 + $0x10] sm:$0xff] %v1005_v3 }
  0x3d   : > { %1008 = vst [vmem:[%s3797_s30 + $0x18] sm:$0xff] %v1007_v4 }
  0x3e   : > { %1014 = vsyncadd [#allocation2], 512 }
  0x3f   : > { %3014 = dma.done.wait [#allocation2], 512 }
  0x40   : > { %3015 = vsyncadd [#allocation2], 4294966784 }
  0x41 PF: > { %s3798_s22 = sld [smem:[#allocation15_spill]]  ;;  %vm1044_vm0 = vcmask 261120   ;;  %v3330_v17 = vld [vmem:[%s934_s3] ss:$0 sm:$0xff]  ;;  %vm1155_vm1 = vcmask 64512   ;;  %s3036_s18 = smov 112  }
  0x42   : > { %s3799_s23 = sld [smem:[#allocation16_spill]]  ;;  %s3037_s3 = smov 120   ;;  %vm1176_vm2 = vcmask 130048   ;;  %v3378_v52 = vld [vmem:[%s937_s4] ss:$0 sm:$0xff]  ;;  %vm1292_vm3 = vcmask 1043456  }
  0x43   : > { %s3800_s7 = sld [smem:[#allocation30_spill]]  ;;  %s3038_s4 = smov 104  }
  0x44   : > { %s3802_s24 = sld [smem:[#allocation22_spill]]  ;;  %s3810_s19 = scalar_lea.vmem %s3746_s15, %s3194_s29 }
  0x45   : > { %s3804_s0 = sld [smem:[#allocation17_spill]]  ;;  %p2768_p6 = scmp.ne.s32.totalorder %s3026_s27, 1 }
  0x47   : > { %v2788_v5 = vld [vmem:[%s3798_s22 + $0x8] sm:$0xff]  ;;  %v2787_v7 = vld [vmem:[%s3798_s22] sm:$0xff]  ;;  %s3807_s22 = scalar_lea.vmem %s3740_s9, %s3194_s29 }
  0x48   : > { %v2790_v6 = vld [vmem:[%s3799_s23 + $0x8] sm:$0xff]  ;;  %v2789_v8 = vld [vmem:[%s3799_s23] sm:$0xff]  ;;  %1057 = vmatpush.bf16.msra.mxu0 %v2788_v5  ;;  %s3814_s23 = sld [smem:[#allocation28_spill]] (!%p2768_p6) }
  0x49   : > { %v3300_v9 = vld [vmem:[%s3800_s7] sm:$0xff]  ;;  %1096 = vmatpush.bf16.msra.mxu1 %v2790_v6  ;;  %v3305_v10 = vld [vmem:[%s3800_s7 + $0x8] sm:$0xff]  ;;  %v3314_v12 = vld [vmem:[%s3800_s7 + $0x10] sm:$0xff] }
  0x4a   : > { %v1022_v11 = vpack.c.bf16 %v3305_v10, %v3300_v9  ;;  %v3319_v13 = vld [vmem:[%s3800_s7 + $0x18] sm:$0xff]  ;;  %s3803_s30 = scalar_lea.vmem %s3802_s24, %s3194_s29  ;;  %s3808_s24 = scalar_lea.vmem %s3741_s10, %s3194_s29 }
  0x4b   : > { %v1023_v14 = vpack.c.bf16 %v3319_v13, %v3314_v12  ;;  %v2846_v21 = vld [vmem:[%s3803_s30] ss:$0 sm:$0xff]  ;;  %v2792_v39 = vld [vmem:[%s3804_s0 + $0x8] sm:$0xff]  ;;  %s3815_s30 = sld [smem:[#allocation33_spill]] (!%p2768_p6) }
  0x4c   : > { %1058 = vmatpush.bf16.msra.mxu0 %v2787_v7  ;;  %1135 = vmatpush.bf16.msra.mxu2 %v2792_v39  ;;  %v2791_v40 = vld [vmem:[%s3804_s0] sm:$0xff] }
  0x4d   : > { %1097 = vmatpush.bf16.msra.mxu1 %v2789_v8 }
  0x4f   : > { %2680 = vmatmul.msk.bf16.vlgmr.msra.gmra.mxu0 %vm1044_vm0, %v1022_v11 }
  0x50   : > { %2690 = vmatmul.msk.bf16.vlgmr.msra.gmra.mxu1 %vm1044_vm0, %v1022_v11  ;;  %1136 = vmatpush.bf16.msra.mxu2 %v2791_v40 }
  0x53   : > { %2700 = vmatmul.msk.bf16.vlgmr.msra.gmra.mxu2 %vm1044_vm0, %v1022_v11 }
  0x5f   : > { %2681 = vmatmul.msk.bf16.gmra.mxu0 %vm1044_vm0, %v1023_v14 }
  0x60   : > { %2691 = vmatmul.msk.bf16.gmra.mxu1 %vm1044_vm0, %v1023_v14 }
  0x63   : > { %2701 = vmatmul.msk.bf16.gmra.mxu2 %vm1044_vm0, %v1023_v14 }
  0xcc   : > { %v1060_v16 = vpop.f32.mrf.mxu0 }
  0xcd   : > { %v1099_v15 = vpop.f32.mrf.mxu1  ;;  %v1061_v25 = vadd.f32 %v2846_v21, %v1060_v16 }
  0xce   : > { %v1100_v19 = vadd.f32 %v3330_v17, %v1099_v15 }
  0xd4   : > { %v1062_v23 = vpop.f32.mrf.mxu0 }
  0xd5   : > { %v1101_v18 = vpop.f32.mrf.mxu1  ;;  %v1063_v26 = vadd.f32 %v2846_v21, %v1062_v23 }
  0xd6   : > { %v1102_v20 = vadd.f32 %v3330_v17, %v1101_v18  ;;  %v1138_v51 = vpop.f32.mrf.mxu2 }
  0xd7   : > { %v3347_v27 = vpack.c.bf16 %v1063_v26, %v1061_v25  ;;  %v1139_v54 = vadd.f32 %v3378_v52, %v1138_v51 }
  0xd8   : > { %v3339_v22 = vpack.c.bf16 %v1102_v20, %v1100_v19 }
  0xda   : > { %1332 = vrot.lane.b32.xlu1 %v3339_v22, %s3036_s18  ;;  %1222 = vrot.lane.b32.xlu0 %v3339_v22, %s3037_s3  ;;  %v1160_v24 = vsel %vm1155_vm1, %v3339_v22, 0 }
  0xdb   : > { %1169 = vmatpush.bf16.xpose.msrb.mxu0 %v1160_v24 }
  0xdc   : > { %v1065_v28 = vpop.f32.mrf.mxu0 }
  0xdd   : > { %v1066_v29 = vadd.f32 %v2846_v21, %v1065_v28 }
  0xde   : > { %v1140_v56 = vpop.f32.mrf.mxu2 }
  0xdf   : > { %v1141_v57 = vadd.f32 %v3378_v52, %v1140_v56 }
  0xe1   : > { %v3382_v59 = vpack.c.bf16 %v1141_v57, %v1139_v54  ;;  %v1150_v57 = vld [vmem:[%s3227_s21 + $0x8] sm:$0xf] }
  0xe2   : > { %1330 = vrot.lane.b32.xlu1 %v3347_v27, %s3036_s18  ;;  %1219 = vrot.lane.b32.xlu0 %v3347_v27, %s3037_s3 }
  0xe3   : > { %2702 = vmatmul.msk.bf16.vlgmr.msrb.gmra.mxu0 %vm1155_vm1, %v3347_v27  ;;  %1210 = vmatpush.bf16.msra.mxu3 %v3382_v59 }
  0xe4   : > { %v1067_v30 = vpop.f32.mrf.mxu0 }
  0xe5   : > { %v1068_v31 = vadd.f32 %v2846_v21, %v1067_v30 }
  0xe7   : > { %v3355_v32 = vpack.c.bf16 %v1068_v31, %v1066_v29 }
 0x14c   : > { %v1333_v33 = vpop.permute.xlu1 %1332  ;;  %v1223_v34 = vpop.permute.xlu0 %1222 }
 0x14d   : > { %v1338_v35 = vsel %vm1155_vm1, %v1333_v33, 0  ;;  %v1228_v36 = vsel %vm1155_vm1, %v1223_v34, 0 }
 0x14e   : > { %1237 = vmatpush.bf16.xpose.msra.mxu0 %v1228_v36 }
 0x154   : > { %v1220_v37 = vpop.permute.xlu0 %1219  ;;  %v1331_v38 = vpop.permute.xlu1 %1330 }
 0x155   : > { %2704 = vmatmul.msk.bf16.vlgmr.msra.gmra.mxu0 %vm1155_vm1, %v1220_v37 }
 0x156   : > { %1347 = vmatpush.bf16.xpose.msrb.mxu0 %v1338_v35 }
 0x160   : > { %v3364_v41 = vpop.f32.mrf.mxu0 }
 0x161   : > { %v1177_v8 = vsel %vm1176_vm2, %v3364_v41, -inf }
 0x165   : > { %2708 = vmatmul.msk.bf16.vlgmr.msrb.gmra.mxu0 %vm1155_vm1, %v1331_v38 }
 0x168   : > { %v3366_v42 = vpop.f32.mrf.mxu0 }
 0x169   : > { %v1180_v11 = vsel %vm1176_vm2, %v3366_v42, -inf }
 0x1d2   : > { %v1239_v43 = vpop.f32.mrf.mxu0 }
 0x1d3   : > { %v1244_v44 = vsel %vm1176_vm2, %v1239_v43, -inf }
 0x1d4   : > { %1245 = vmax.xlane.f32.xlu2 %v1244_v44 }
 0x1da   : > { %v1241_v45 = vpop.f32.mrf.mxu0 }
 0x1db   : > { %v1247_v46 = vsel %vm1176_vm2, %v1241_v45, -inf }
 0x1dc   : > { %1248 = vmax.xlane.f32.xlu2 %v1247_v46 }
 0x1e2   : > { %v1349_v47 = vpop.f32.mrf.mxu0 }
 0x1e3   : > { %v1354_v48 = vsel %vm1176_vm2, %v1349_v47, -inf }
 0x1e4   : > { %1355 = vmax.xlane.f32.xlu0 %v1354_v48  ;;  %v1149_v48 = vld [vmem:[%s3227_s21 + $0x4] sm:$0xf] }
 0x1ea   : > { %v1351_v49 = vpop.f32.mrf.mxu0 }
 0x1eb   : > { %v1357_v50 = vsel %vm1176_vm2, %v1351_v49, -inf }
 0x1ec   : > { %1358 = vmax.xlane.f32.xlu1 %v1357_v50  ;;  %v1104_v50 = vpop.f32.mrf.mxu1 }
 0x1f4   : > { %v1106_v51 = vpop.f32.mrf.mxu1 }
 0x1f5   : > { %v1107_v54 = vadd.f32 %v3330_v17, %v1106_v51 }
 0x205   : > { %1377 = vrot.lane.b32.xlu1 %v3382_v59, %s3036_s18 }
 0x247   : > { %v1246_v53 = vpop.xlane.xlu2 %1245 }
 0x248   : > { %v1250_v55 = vsub.f32 %v1239_v43, %v1246_v53  ;;  %v1105_v53 = vadd.f32 %v3330_v17, %v1104_v50 }
 0x24a   : > { %v1252_v58 = vmul.f32 1.442695, %v1250_v55  ;;  %v1148_v55 = vld [vmem:[%s3227_s21] sm:$0xf] }
 0x24b   : > { %v1314_v56 = vsel %vm1292_vm3, %v1148_v55, 0 }
 0x24c   : > { %2856 = vpow2.f32 %v1252_v58  ;;  %1323 = vmatpush.bf16.msrb.mxu3 %v1314_v56  ;;  %v3414_v58 = vpack.c.bf16 %v1107_v54, %v1105_v53 }
 0x24f   : > { %v1249_v60 = vpop.xlane.xlu2 %1248 }
 0x250   : > { %v1251_v61 = vsub.f32 %v1241_v45, %v1249_v60  ;;  %v1402_v60 = vsel %vm1292_vm3, %v1150_v57, 0 }
 0x252   : > { %v2857_v62 = vpop.eup %2856  ;;  %v1254_v63 = vmul.f32 1.442695, %v1251_v61 }
 0x253   : > { %v1256_v0 = vsel %vm1176_vm2, %v2857_v62, 0.0 }
 0x254   : > { %2858 = vpow2.f32 %v1254_v63  ;;  %1257 = vadd.xlane.f32.xlu2 %v1256_v0  ;;  %v1517_v63 = vsel %vm1155_vm1, %v3414_v58, 0 }
 0x257   : > { %v1356_v14 = vpop.xlane.xlu0 %1355 }
 0x258   : > { %v1360_v15 = vsub.f32 %v1349_v47, %v1356_v14 }
 0x25a   : > { %v2859_v1 = vpop.eup %2858  ;;  %v1362_v16 = vmul.f32 1.442695, %v1360_v15  ;;  %v1143_v15 = vpop.f32.mrf.mxu2 }
 0x25b   : > { %v1259_v2 = vsel %vm1176_vm2, %v2859_v1, 0.0 }
 0x25c   : > { %1260 = vadd.xlane.f32.xlu2 %v1259_v2 }
 0x25f   : > { %v1359_v3 = vpop.xlane.xlu1 %1358 }
 0x260   : > { %v1361_v4 = vsub.f32 %v1351_v49, %v1359_v3  ;;  %v1294_v49 = vsel %vm1292_vm3, %v1149_v48, 0 }
 0x261   : > { %1303 = vmatpush.bf16.msrb.mxu2 %v1294_v49 }
 0x262   : > { %v1364_v5 = vmul.f32 1.442695, %v1361_v4 }
 0x264   : > { %2860 = vpow2.f32 %v1364_v5 }
 0x265   : > { %2862 = vpow2.f32 %v1362_v16  ;;  %1411 = vmatpush.bf16.msra.mxu2 %v1402_v60 }
 0x26a   : > { %v2861_v6 = vpop.eup %2860 }
 0x26b   : > { %v1369_v7 = vsel %vm1176_vm2, %v2861_v6, 0.0  ;;  %v2863_v18 = vpop.eup %2862 }
 0x26c   : > { %1370 = vadd.xlane.f32.xlu0 %v1369_v7  ;;  %v1366_v19 = vsel %vm1176_vm2, %v2863_v18, 0.0 }
 0x274   : > { %1178 = vmax.xlane.f32.xlu0 %v1177_v8  ;;  %1268 = vrot.lane.b32.xlu2 %v3382_v59, %s3037_s3 }
 0x277   : > { %v1378_v25 = vpop.permute.xlu1 %1377 }
 0x27c   : > { %1181 = vmax.xlane.f32.xlu0 %v1180_v11 }
 0x29d   : > { %1367 = vadd.xlane.f32.xlu2 %v1366_v19  ;;  %v1144_v19 = vadd.f32 %v3378_v52, %v1143_v15 }
 0x2b5   : > { %1420 = vrot.lane.b32.xlu2 %v3347_v27, %s3038_s4 }
 0x2c7   : > { %v1258_v20 = vpop.xlane.xlu2 %1257 }
 0x2c8   : > { %2864 = vrcp.f32 %v1258_v20 }
 0x2ce   : > { %v2865_v23 = vpop.eup %2864 }
 0x2cf   : > { %v1261_v21 = vpop.xlane.xlu2 %1260  ;;  %v1264_v26 = vmul.f32 %v2865_v23, %v2857_v62 }
 0x2d0   : > { %2866 = vrcp.f32 %v1261_v21 }
 0x2d6   : > { %v2867_v24 = vpop.eup %2866 }
 0x2d7   : > { %v1265_v28 = vmul.f32 %v2867_v24, %v2859_v1  ;;  %v1269_v29 = vpop.permute.xlu2 %1268 }
 0x2d8   : > { %1281 = vmatpush.bf16.msrb.mxu1 %v1269_v29 }
 0x2d9   : > { %v1266_v30 = vpack.c.bf16 %v1265_v28, %v1264_v26 }
 0x2db   : > { %2705 = vmatmul.msk.bf16.vlgmr.msrb.gmra.mxu1 %vm1176_vm2, %v1266_v30 }
 0x2dc   : > { %1390 = vmatpush.bf16.msra.mxu1 %v1378_v25 }
 0x2df   : > { %v1371_v31 = vpop.xlane.xlu0 %1370 }
 0x2e7   : > { %v1179_v33 = vpop.xlane.xlu0 %1178 }
 0x2e8   : > { %v1183_v34 = vsub.f32 %v3364_v41, %v1179_v33 }
 0x2ea   : > { %v1185_v27 = vmul.f32 1.442695, %v1183_v34 }
 0x2ec   : > { %2868 = vpow2.f32 %v1185_v27 }
 0x2ef   : > { %v1182_v35 = vpop.xlane.xlu0 %1181 }
 0x2f0   : > { %v1184_v36 = vsub.f32 %v3366_v42, %v1182_v35 }
 0x2f2   : > { %v2869_v37 = vpop.eup %2868  ;;  %v1187_v38 = vmul.f32 1.442695, %v1184_v36 }
 0x2f3   : > { %v1189_v39 = vsel %vm1176_vm2, %v2869_v37, 0.0 }
 0x2f4   : > { %2870 = vpow2.f32 %v1187_v38  ;;  %1190 = vadd.xlane.f32.xlu0 %v1189_v39 }
 0x2f5   : > { %2872 = vrcp.f32 %v1371_v31 }
 0x2fa   : > { %v2871_v40 = vpop.eup %2870 }
 0x2fb   : > { %v1192_v43 = vsel %vm1176_vm2, %v2871_v40, 0.0  ;;  %v2873_v44 = vpop.eup %2872 }
 0x2fc   : > { %1193 = vadd.xlane.f32.xlu1 %v1192_v43  ;;  %v1375_v45 = vmul.f32 %v2873_v44, %v2861_v6 }
 0x308   : > { %1422 = vrot.lane.b32.xlu0 %v3339_v22, %s3038_s4 }
 0x310   : > { %v1368_v41 = vpop.xlane.xlu2 %1367 }
 0x311   : > { %2874 = vrcp.f32 %v1368_v41 }
 0x317   : > { %v2875_v42 = vpop.eup %2874 }
 0x318   : > { %v1374_v46 = vmul.f32 %v2875_v42, %v2863_v18  ;;  %v1145_v18 = vpop.f32.mrf.mxu2  ;;  %v1421_v26 = vpop.permute.xlu2 %1420 }
 0x319   : > { %v1146_v20 = vadd.f32 %v3378_v52, %v1145_v18 }
 0x31a   : > { %v1376_v47 = vpack.c.bf16 %v1375_v45, %v1374_v46 }
 0x31b   : > { %v3427_v21 = vpack.c.bf16 %v1146_v20, %v1144_v19 }
 0x31c   : > { %2709 = vmatmul.msk.bf16.vlgmr.msra.gmra.mxu1 %vm1176_vm2, %v1376_v47 }
 0x358   : > { %v1283_v22 = vpop.f32.mrf.mxu1 }
 0x360   : > { %v1285_v61 = vpop.f32.mrf.mxu1 }
 0x361   : > { %v1288_v62 = vpack.c.bf16 %v1285_v61, %v1283_v22 }
 0x363   : > { %2706 = vmatmul.msk.bf16.vlgmr.msrb.gmra.mxu2 %vm1155_vm1, %v1288_v62 }
 0x364   : > { %1526 = vmatpush.bf16.xpose.msrb.mxu2 %v1517_v63 }
 0x367   : > { %v1191_v0 = vpop.xlane.xlu0 %1190 }
 0x368   : > { %2876 = vrcp.f32 %v1191_v0 }
 0x36e   : > { %v2877_v1 = vpop.eup %2876 }
 0x36f   : > { %v1194_v17 = vpop.xlane.xlu1 %1193  ;;  %v1197_v3 = vmul.f32 %v2877_v1, %v2869_v37 }
 0x370   : > { %2878 = vrcp.f32 %v1194_v17 }
 0x376   : > { %v2879_v2 = vpop.eup %2878 }
 0x377   : > { %v1198_v4 = vmul.f32 %v2879_v2, %v2871_v40 }
 0x379   : > { %v1199_v5 = vpack.c.bf16 %v1198_v4, %v1197_v3 }
 0x37a   : > { %v1423_v6 = vpop.permute.xlu0 %1422 }
 0x37b   : > { %v1428_v7 = vsel %vm1155_vm1, %v1423_v6, 0  ;;  %2703 = vmatmul.msk.bf16.vlgmr.msra.gmra.mxu3 %vm1176_vm2, %v1199_v5 }
 0x37c   : > { %1437 = vmatpush.bf16.xpose.msra.mxu3 %v1428_v7 }
 0x399   : > { %v1392_v8 = vpop.f32.mrf.mxu1 }
 0x3a1   : > { %v1394_v11 = vpop.f32.mrf.mxu1 }
 0x3a2   : > { %v1397_v14 = vpack.c.bf16 %v1394_v11, %v1392_v8 }
 0x3a4   : > { %2710 = vmatmul.msk.bf16.vlgmr.msra.gmra.mxu2 %vm1155_vm1, %v1397_v14 }
 0x3a5   : > { %1655 = vmatpush.bf16.msra.mxu2 %v1294_v49 }
 0x3b4   : > { %2714 = vmatmul.msk.bf16.vlgmr.msrb.gmra.mxu2 %vm1155_vm1, %v3355_v32 }
 0x3b5   : > { %1757 = vmatpush.bf16.msrb.mxu2 %v1402_v60 }
 0x3e6   : > { %v3431_v25 = vpop.f32.mrf.mxu2 }
 0x3ee   : > { %v3434_v28 = vpop.f32.mrf.mxu2 }
 0x3fe   : > { %v1212_v16 = vpop.f32.mrf.mxu3 }
 0x406   : > { %v1214_v23 = vpop.f32.mrf.mxu3 }
 0x407   : > { %v1217_v24 = vpack.c.bf16 %v1214_v23, %v1212_v16 }
 0x409   : > { %2707 = vmatmul.msk.bf16.vlgmr.msrb.gmra.mxu3 %vm1155_vm1, %v1217_v24 }
 0x40a   : > { %1566 = vmatpush.bf16.msrb.mxu3 %v3427_v21 }
 0x419   : > { %2711 = vmatmul.msk.bf16.vlgmr.msra.gmra.mxu3 %vm1155_vm1, %v1421_v26 }
 0x41a   : > { %1672 = vmatpush.bf16.msra.mxu3 %v1314_v56 }
 0x427   : > { %v3436_v29 = vpop.f32.mrf.mxu2 }
 0x42f   : > { %v3438_v30 = vpop.f32.mrf.mxu2 }
 0x437   : > { %v1528_v52 = vpop.f32.mrf.mxu2 }
 0x438   : > { %v1533_v31 = vsel %vm1176_vm2, %v1528_v52, -inf }
 0x439   : > { %1534 = vmax.xlane.f32.xlu0 %v1533_v31 }
 0x43f   : > { %v1530_v33 = vpop.f32.mrf.mxu2 }
 0x440   : > { %v1536_v34 = vsel %vm1176_vm2, %v1530_v33, -inf }
 0x441   : > { %1537 = vmax.xlane.f32.xlu2 %v1536_v34 }
 0x459   : > { %1578 = vrot.lane.b32.xlu2 %v3414_v58, %s3037_s3 }
 0x461   : > { %1768 = vrot.lane.b32.xlu2 %v3414_v58, %s3038_s4 }
 0x48c   : > { %v3446_v36 = vpop.f32.mrf.mxu3 }
 0x494   : > { %v3449_v44 = vpop.f32.mrf.mxu3 }
 0x49c   : > { %v1439_v46 = vpop.f32.mrf.mxu3 }
 0x49d   : > { %v1444_v47 = vsel %vm1176_vm2, %v1439_v46, -inf }
 0x4a4   : > { %v1441_v48 = vpop.f32.mrf.mxu3 }
 0x4a5   : > { %v1447_v49 = vsel %vm1176_vm2, %v1441_v48, -inf }
 0x4ac   : > { %v1535_v27 = vpop.xlane.xlu0 %1534 }
 0x4ad   : > { %v1539_v35 = vsub.f32 %v1528_v52, %v1535_v27 }
 0x4af   : > { %v1541_v37 = vmul.f32 1.442695, %v1539_v35 }
 0x4b1   : > { %2880 = vpow2.f32 %v1541_v37 }
 0x4b4   : > { %v1538_v38 = vpop.xlane.xlu2 %1537 }
 0x4b5   : > { %v1540_v39 = vsub.f32 %v1530_v33, %v1538_v38  ;;  %v1151_v33 = vld [vmem:[%s3227_s21 + $0xc] sm:$0xf]  ;;  %s3811_s21 = scalar_lea.vmem %s3747_s16, %s3194_s29 }
 0x4b6   : > { %v3477_v34 = vsel %vm1292_vm3, %v1151_v33, 0 }
 0x4b7   : > { %v2881_v40 = vpop.eup %2880  ;;  %v1543_v43 = vmul.f32 1.442695, %v1540_v39  ;;  %1501 = vmatpush.bf16.msrb.mxu1 %v3477_v34 }
 0x4b8   : > { %v1545_v41 = vsel %vm1176_vm2, %v2881_v40, 0.0 }
 0x4b9   : > { %2882 = vpow2.f32 %v1543_v43  ;;  %1546 = vadd.xlane.f32.xlu1 %v1545_v41 }
 0x4bc   : > { %v1579_v51 = vpop.permute.xlu2 %1578 }
 0x4bd   : > { %v1584_v20 = vsel %vm1155_vm1, %v1579_v51, 0 }
 0x4bf   : > { %v2883_v42 = vpop.eup %2882 }
 0x4c0   : > { %v1548_v45 = vsel %vm1176_vm2, %v2883_v42, 0.0 }
 0x4c1   : > { %1549 = vadd.xlane.f32.xlu1 %v1548_v45 }
 0x4c4   : > { %v1769_v60 = vpop.permute.xlu2 %1768 }
 0x4c5   : > { %v1774_v0 = vsel %vm1155_vm1, %v1769_v60, 0 }
 0x4c9   : > { %1445 = vmax.xlane.f32.xlu1 %v1444_v47 }
 0x4d1   : > { %1448 = vmax.xlane.f32.xlu1 %v1447_v49 }
 0x52c   : > { %v1547_v50 = vpop.xlane.xlu1 %1546 }
 0x52d   : > { %2884 = vrcp.f32 %v1547_v50 }
 0x533   : > { %v2885_v53 = vpop.eup %2884 }
 0x534   : > { %v1550_v22 = vpop.xlane.xlu1 %1549  ;;  %v1553_v55 = vmul.f32 %v2885_v53, %v2881_v40  ;;  %v1326_v53 = vadd.f32 %v3446_v36, %v3431_v25 }
 0x535   : > { %2886 = vrcp.f32 %v1550_v22 }
 0x53b   : > { %v2887_v54 = vpop.eup %2886 }
 0x53c   : > { %v1554_v56 = vmul.f32 %v2887_v54, %v2883_v42  ;;  %v1446_v57 = vpop.xlane.xlu1 %1445 }
 0x53d   : > { %v1450_v61 = vsub.f32 %v1439_v46, %v1446_v57  ;;  %v3501_v57 = vld [vmem:[%s945_s28] ss:$0 sm:$0xff] }
 0x53e   : > { %v1555_v62 = vpack.c.bf16 %v1554_v56, %v1553_v55  ;;  %v1418_v56 = vadd.f32 %v3436_v29, %v1326_v53 }
 0x53f   : > { %v1452_v63 = vmul.f32 1.442695, %v1450_v61 }
 0x540   : > { %2715 = vmatmul.msk.bf16.vlgmr.msrb.gmra.mxu3 %vm1176_vm2, %v1555_v62 }
 0x541   : > { %2888 = vpow2.f32 %v1452_v63  ;;  %1783 = vmatpush.bf16.xpose.msrb.mxu3 %v1774_v0 }
 0x544   : > { %v1449_v17 = vpop.xlane.xlu1 %1448 }
 0x545   : > { %v1451_v1 = vsub.f32 %v1441_v48, %v1449_v17 }
 0x547   : > { %v2889_v2 = vpop.eup %2888  ;;  %v1454_v3 = vmul.f32 1.442695, %v1451_v1 }
 0x548   : > { %v1456_v4 = vsel %vm1176_vm2, %v2889_v2, 0.0 }
 0x549   : > { %2890 = vpow2.f32 %v1454_v3  ;;  %1457 = vadd.xlane.f32.xlu0 %v1456_v4 }
 0x54f   : > { %v2891_v5 = vpop.eup %2890 }
 0x550   : > { %v1459_v6 = vsel %vm1176_vm2, %v2891_v5, 0.0 }
 0x551   : > { %1460 = vadd.xlane.f32.xlu1 %v1459_v6 }
 0x55d   : > { %1467 = vrot.lane.b32.xlu0 %v3382_v59, %s3038_s4 }
 0x565   : > { %1681 = vrot.lane.b32.xlu0 %v3414_v58, %s3036_s18 }
 0x56a   : > { %1575 = vrot.lane.b32.xlu1 %v3355_v32, %s3037_s3 }
 0x56d   : > { %1679 = vrot.lane.b32.xlu0 %v3355_v32, %s3036_s18 }
 0x572   : > { %1766 = vrot.lane.b32.xlu1 %v3355_v32, %s3038_s4 }
 0x5bc   : > { %v1458_v7 = vpop.xlane.xlu0 %1457 }
 0x5c3   : > { %v1568_v8 = vpop.f32.mrf.mxu3 }
 0x5c4   : > { %v1461_v11 = vpop.xlane.xlu1 %1460 }
 0x5c5   : > { %2892 = vrcp.f32 %v1461_v11 }
 0x5c6   : > { %2894 = vrcp.f32 %v1458_v7 }
 0x5cb   : > { %v2893_v14 = vpop.eup %2892  ;;  %v1570_v15 = vpop.f32.mrf.mxu3 }
 0x5cc   : > { %v2895_v59 = vpop.eup %2894  ;;  %v1573_v16 = vpack.c.bf16 %v1570_v15, %v1568_v8  ;;  %v1465_v18 = vmul.f32 %v2893_v14, %v2891_v5 }
 0x5cd   : > { %v1464_v58 = vmul.f32 %v2895_v59, %v2889_v2 }
 0x5ce   : > { %2719 = vmatmul.msk.bf16.vlgmr.msra.gmra.mxu3 %vm1155_vm1, %v1573_v16 }
 0x5cf   : > { %v1468_v19 = vpop.permute.xlu0 %1467  ;;  %v1466_v23 = vpack.c.bf16 %v1465_v18, %v1464_v58 }
 0x5d0   : > { %1480 = vmatpush.bf16.msra.mxu0 %v1468_v19 }
 0x5d3   : > { %2712 = vmatmul.msk.bf16.vlgmr.msra.gmra.mxu0 %vm1176_vm2, %v1466_v23 }
 0x5d4   : > { %1593 = vmatpush.bf16.xpose.msrb.mxu0 %v1584_v20 }
 0x5d7   : > { %v1682_v32 = vpop.permute.xlu0 %1681 }
 0x5d8   : > { %v1687_v24 = vsel %vm1155_vm1, %v1682_v32, 0 }
 0x5dc   : > { %1696 = vmatpush.bf16.xpose.msra.mxu0 %v1687_v24  ;;  %v1576_v26 = vpop.permute.xlu1 %1575 }
 0x5df   : > { %v1680_v31 = vpop.permute.xlu0 %1679 }
 0x5e3   : > { %2716 = vmatmul.msk.bf16.vlgmr.msrb.gmra.mxu0 %vm1155_vm1, %v1576_v26 }
 0x5e4   : > { %v1767_v52 = vpop.permute.xlu1 %1766 }
 0x5e5   : > { %2723 = vmatmul.msk.bf16.vlgmr.msrb.gmra.mxu3 %vm1155_vm1, %v1767_v52 }
 0x5f3   : > { %2720 = vmatmul.msk.bf16.vlgmr.msra.gmra.mxu0 %vm1155_vm1, %v1680_v31 }
 0x650   : > { %v1482_v27 = vpop.f32.mrf.mxu0 }
 0x651   : > { %v3480_v38 = vpop.f32.mrf.mxu3 }
 0x658   : > { %v1484_v35 = vpop.f32.mrf.mxu0 }
 0x659   : > { %v1487_v37 = vpack.c.bf16 %v1484_v35, %v1482_v27  ;;  %v3484_v43 = vpop.f32.mrf.mxu3  ;;  %v1328_v27 = vadd.f32 %v3449_v44, %v3434_v28 }
 0x65b   : > { %2713 = vmatmul.msk.bf16.vlgmr.msrb.gmra.mxu1 %vm1155_vm1, %v1487_v37  ;;  %v1419_v37 = vadd.f32 %v3438_v30, %v1328_v27 }
 0x660   : > { %v1595_v39 = vpop.f32.mrf.mxu0 }
 0x661   : > { %v1600_v40 = vsel %vm1176_vm2, %v1595_v39, -inf }
 0x662   : > { %1601 = vmax.xlane.f32.xlu2 %v1600_v40 }
 0x668   : > { %v1597_v41 = vpop.f32.mrf.mxu0  ;;  %v1785_v45 = vpop.f32.mrf.mxu3 }
 0x669   : > { %v1603_v42 = vsel %vm1176_vm2, %v1597_v41, -inf  ;;  %v1790_v48 = vsel %vm1176_vm2, %v1785_v45, -inf }
 0x66a   : > { %1604 = vmax.xlane.f32.xlu0 %v1603_v42 }
 0x670   : > { %v1698_v46 = vpop.f32.mrf.mxu0  ;;  %v1787_v49 = vpop.f32.mrf.mxu3 }
 0x671   : > { %v1703_v47 = vsel %vm1176_vm2, %v1698_v46, -inf  ;;  %v1793_v22 = vsel %vm1176_vm2, %v1787_v49, -inf }
 0x672   : > { %1704 = vmax.xlane.f32.xlu1 %v1703_v47  ;;  %1791 = vmax.xlane.f32.xlu0 %v1790_v48 }
 0x678   : > { %v1700_v50 = vpop.f32.mrf.mxu0 }
 0x679   : > { %v1706_v51 = vsel %vm1176_vm2, %v1700_v50, -inf }
 0x67a   : > { %1707 = vmax.xlane.f32.xlu2 %v1706_v51  ;;  %1794 = vmax.xlane.f32.xlu1 %v1793_v22 }
 0x693   : > { %1624 = vrot.lane.b32.xlu1 %v3427_v21, %s3037_s3 }
 0x6d5   : > { %v1602_v54 = vpop.xlane.xlu2 %1601 }
 0x6d6   : > { %v1606_v55 = vsub.f32 %v1595_v39, %v1602_v54 }
 0x6d8   : > { %v1608_v60 = vmul.f32 1.442695, %v1606_v55  ;;  %v1503_v61 = vpop.f32.mrf.mxu1 }
 0x6d9   : > { %v1508_v62 = vadd.f32 %v1503_v61, %v1418_v56 }
 0x6da   : > { %2896 = vpow2.f32 %v1608_v60 }
 0x6db   : > { %v1857_v63 = vadd.f32 %v3501_v57, %v1508_v62 }
 0x6dd   : > { %v1605_v0 = vpop.xlane.xlu0 %1604  ;;  %v3505_v17 = vadd.f32 %v1857_v63, %v3300_v9 }
 0x6de   : > { %v1607_v25 = vsub.f32 %v1597_v41, %v1605_v0 }
 0x6df   : > { %v1865_v29 = vsel %vm1044_vm0, %v3505_v17, 0.0 }
 0x6e0   : > { %v2897_v36 = vpop.eup %2896  ;;  %v1610_v1 = vmul.f32 1.442695, %v1607_v25  ;;  %1866 = vadd.xlane.f32.xlu1 %v1865_v29  ;;  %v1505_v35 = vpop.f32.mrf.mxu1 }
 0x6e1   : > { %v1612_v2 = vsel %vm1176_vm2, %v2897_v36, 0.0  ;;  %v1509_v39 = vadd.f32 %v1505_v35, %v1419_v37 }
 0x6e2   : > { %2898 = vpow2.f32 %v1610_v1  ;;  %1613 = vadd.xlane.f32.xlu2 %v1612_v2 }
 0x6e3   : > { %v1858_v40 = vadd.f32 %v3501_v57, %v1509_v39 }
 0x6e5   : > { %v1705_v3 = vpop.xlane.xlu1 %1704  ;;  %v1792_v4 = vpop.xlane.xlu0 %1791  ;;  %v3524_v41 = vadd.f32 %v1858_v40, %v3305_v10 }
 0x6e6   : > { %v1709_v5 = vsub.f32 %v1698_v46, %v1705_v3  ;;  %v1796_v8 = vsub.f32 %v1785_v45, %v1792_v4 }
 0x6e7   : > { %v1868_v42 = vsel %vm1044_vm0, %v3524_v41, 0.0 }
 0x6e8   : > { %v2899_v6 = vpop.eup %2898  ;;  %v1711_v7 = vmul.f32 1.442695, %v1709_v5  ;;  %v1798_v11 = vmul.f32 1.442695, %v1796_v8  ;;  %v3039_v8 = vmov 32.0  }
 0x6e9   : > { %v1615_v9 = vsel %vm1176_vm2, %v2899_v6, 0.0 }
 0x6ea   : > { %1616 = vadd.xlane.f32.xlu0 %v1615_v9  ;;  %2900 = vpow2.f32 %v1711_v7 }
 0x6eb   : > { %2902 = vpow2.f32 %v1798_v11 }
 0x6ed   : > { %v1708_v14 = vpop.xlane.xlu2 %1707  ;;  %v1795_v15 = vpop.xlane.xlu1 %1794 }
 0x6ee   : > { %v1710_v59 = vsub.f32 %v1700_v50, %v1708_v14  ;;  %v1797_v18 = vsub.f32 %v1787_v49, %v1795_v15 }
 0x6f0   : > { %v1713_v16 = vmul.f32 1.442695, %v1710_v59  ;;  %v2901_v58 = vpop.eup %2900  ;;  %v1800_v20 = vmul.f32 1.442695, %v1797_v18 }
 0x6f1   : > { %v1715_v19 = vsel %vm1176_vm2, %v2901_v58, 0.0  ;;  %v2903_v23 = vpop.eup %2902 }
 0x6f2   : > { %2904 = vpow2.f32 %v1713_v16  ;;  %1716 = vadd.xlane.f32.xlu2 %v1715_v19  ;;  %v1802_v26 = vsel %vm1176_vm2, %v2903_v23, 0.0 }
 0x6f3   : > { %2906 = vpow2.f32 %v1800_v20 }
 0x6f8   : > { %v2905_v32 = vpop.eup %2904 }
 0x6f9   : > { %v1718_v24 = vsel %vm1176_vm2, %v2905_v32, 0.0  ;;  %v2907_v52 = vpop.eup %2906 }
 0x6fa   : > { %1719 = vadd.xlane.f32.xlu0 %v1718_v24  ;;  %1803 = vadd.xlane.f32.xlu2 %v1802_v26  ;;  %v1805_v31 = vsel %vm1176_vm2, %v2907_v52, 0.0 }
 0x702   : > { %1806 = vadd.xlane.f32.xlu0 %v1805_v31 }
 0x705   : > { %v1625_v33 = vpop.permute.xlu1 %1624 }
 0x706   : > { %1637 = vmatpush.bf16.msra.mxu1 %v1625_v33 }
 0x712   : > { %1726 = vrot.lane.b32.xlu2 %v3427_v21, %s3036_s18  ;;  %s3812_s18 = sld [smem:[#allocation29_spill]] (!%p2768_p6) }
 0x716   : > { %1813 = vrot.lane.b32.xlu0 %v3427_v21, %s3038_s4 }
 0x740   : > { %1869 = vadd.xlane.f32.xlu0 %v1868_v42 }
 0x753   : > { %v1867_v35 = vpop.xlane.xlu1 %1866 }
 0x755   : > { %v1614_v45 = vpop.xlane.xlu2 %1613 }
 0x756   : > { %2908 = vrcp.f32 %v1614_v45 }
 0x75c   : > { %v2909_v21 = vpop.eup %2908 }
 0x75d   : > { %v1617_v46 = vpop.xlane.xlu0 %1616  ;;  %v1620_v28 = vmul.f32 %v2909_v21, %v2897_v36 }
 0x75e   : > { %2910 = vrcp.f32 %v1617_v46 }
 0x764   : > { %v2911_v47 = vpop.eup %2910 }
 0x765   : > { %v1621_v44 = vmul.f32 %v2911_v47, %v2899_v6  ;;  %v1717_v48 = vpop.xlane.xlu2 %1716 }
 0x766   : > { %2912 = vrcp.f32 %v1717_v48 }
 0x767   : > { %v1622_v30 = vpack.c.bf16 %v1621_v44, %v1620_v28 }
 0x769   : > { %2717 = vmatmul.msk.bf16.vlgmr.msra.gmra.mxu1 %vm1176_vm2, %v1622_v30 }
 0x76c   : > { %v2913_v50 = vpop.eup %2912 }
 0x76d   : > { %v1720_v49 = vpop.xlane.xlu0 %1719  ;;  %v1804_v10 = vpop.xlane.xlu2 %1803  ;;  %v1723_v22 = vmul.f32 %v2913_v50, %v2901_v58 }
 0x76e   : > { %2914 = vrcp.f32 %v1720_v49 }
 0x774   : > { %v2915_v51 = vpop.eup %2914 }
 0x775   : > { %v1724_v53 = vmul.f32 %v2915_v51, %v2905_v32  ;;  %v1727_v54 = vpop.permute.xlu2 %1726  ;;  %v1807_v56 = vpop.xlane.xlu0 %1806 }
 0x776   : > { %1739 = vmatpush.bf16.msrb.mxu1 %v1727_v54  ;;  %2916 = vrcp.f32 %v1807_v56 }
 0x777   : > { %v1725_v55 = vpack.c.bf16 %v1724_v53, %v1723_v22  ;;  %2918 = vrcp.f32 %v1804_v10  ;;  %v2794_v53 = vld [vmem:[%s3244_s25 + $0x8] sm:$0xff] }
 0x778   : > { %2920 = vrcp.f32 %v3039_v8  ;;  %v2850_v8 = vld [vmem:[%s3807_s22] ss:$0 sm:$0xff] }
 0x779   : > { %2721 = vmatmul.msk.bf16.vlgmr.msrb.gmra.mxu1 %vm1176_vm2, %v1725_v55 }
 0x77a   : > { %1844 = vmatpush.bf16.msra.mxu1 %v3477_v34 }
 0x77c   : > { %v2917_v60 = vpop.eup %2916 }
 0x77d   : > { %v2919_v61 = vpop.eup %2918  ;;  %v1811_v62 = vmul.f32 %v2917_v60, %v2907_v52  ;;  %v2793_v60 = vld [vmem:[%s3244_s25] sm:$0xff] }
 0x77e   : > { %v1810_v63 = vmul.f32 %v2919_v61, %v2903_v23  ;;  %v2921_v11 = vpop.eup %2920 }
 0x77f   : > { %v1878_v14 = vmul.f32 32.0, %v2921_v11  ;;  %vm1882_vm4 = vweird.f32 %v2921_v11 }
 0x780   : > { %v1812_v25 = vpack.c.bf16 %v1811_v62, %v1810_v63 }
 0x781   : > { %v1879_v59 = vsub.f32 1.0, %v1878_v14 }
 0x783   : > { %v1880_v58 = vmul.f32 %v2921_v11, %v1879_v59 }
 0x785   : > { %v1881_v32 = vadd.f32 %v2921_v11, %v1880_v58 }
 0x787   : > { %v3540_v27 = vsel %vm1882_vm4, %v2921_v11, %v1881_v32 }
 0x788   : > { %v1814_v0 = vpop.permute.xlu0 %1813  ;;  %v1884_v39 = vmul.f32 %v3540_v27, %v1867_v35 }
 0x789   : > { %1826 = vmatpush.bf16.msrb.mxu0 %v1814_v0 }
 0x78a   : > { %v1888_v45 = vsub.f32 %v3505_v17, %v1884_v39  ;;  %v2800_v39 = vld [vmem:[%s3254_s26 + $0x28] sm:$0xff] }
 0x78c   : > { %2724 = vmatmul.msk.bf16.vlgmr.msrb.gmra.mxu0 %vm1176_vm2, %v1812_v25  ;;  %v1892_v21 = vmul.f32 %v1888_v45, %v1888_v45 }
 0x78e   : > { %v1896_v28 = vsel %vm1044_vm0, %v1892_v21, 0.0 }
 0x7e6   : > { %v1639_v29 = vpop.f32.mrf.mxu1 }
 0x7ee   : > { %v1641_v36 = vpop.f32.mrf.mxu1 }
 0x7ef   : > { %v1644_v1 = vpack.c.bf16 %v1641_v36, %v1639_v29 }
 0x7f1   : > { %2718 = vmatmul.msk.bf16.vlgmr.msra.gmra.mxu2 %vm1155_vm1, %v1644_v1 }
 0x7f2   : > { %2010 = vmatpush.bf16.msra.mxu2 %v2794_v53 }
 0x7f6   : > { %v1741_v34 = vpop.f32.mrf.mxu1  ;;  %2011 = vmatpush.bf16.msra.mxu2 %v2793_v60 }
 0x7fe   : > { %v1743_v2 = vpop.f32.mrf.mxu1 }
 0x7ff   : > { %v1746_v3 = vpack.c.bf16 %v1743_v2, %v1741_v34 }
 0x801   : > { %2722 = vmatmul.msk.bf16.vlgmr.msrb.gmra.mxu2 %vm1155_vm1, %v1746_v3 }
 0x809   : > { %v1828_v4 = vpop.f32.mrf.mxu0 }
 0x811   : > { %v1830_v5 = vpop.f32.mrf.mxu0 }
 0x812   : > { %v1833_v6 = vpack.c.bf16 %v1830_v5, %v1828_v4 }
 0x814   : > { %2725 = vmatmul.msk.bf16.vlgmr.msra.gmra.mxu1 %vm1155_vm1, %v1833_v6 }
 0x874   : > { %v1657_v7 = vpop.f32.mrf.mxu2 }
 0x875   : > { %v1675_v16 = vadd.f32 %v3480_v38, %v1657_v7 }
 0x87c   : > { %v1659_v9 = vpop.f32.mrf.mxu2 }
 0x87d   : > { %v1677_v26 = vadd.f32 %v3484_v43, %v1659_v9 }
 0x884   : > { %v1759_v15 = vpop.f32.mrf.mxu2 }
 0x885   : > { %v1764_v18 = vadd.f32 %v1759_v15, %v1675_v16  ;;  %v2851_v15 = vld [vmem:[%s3808_s24] ss:$0 sm:$0xff] }
 0x88c   : > { %v1761_v24 = vpop.f32.mrf.mxu2 }
 0x88d   : > { %v1765_v31 = vadd.f32 %v1761_v24, %v1677_v26  ;;  %v2802_v26 = vld [vmem:[%s3254_s26 + $0x38] sm:$0xff] }
 0x88e   : > { %2097 = vmatpush.bf16.msra.mxu3 %v2802_v26 }
 0x891   : > { %v1846_v19 = vpop.f32.mrf.mxu1 }
 0x892   : > { %v1851_v20 = vadd.f32 %v1846_v19, %v1764_v18 }
 0x894   : > { %v1859_v23 = vadd.f32 %v3501_v57, %v1851_v20 }
 0x896   : > { %v1863_v52 = vadd.f32 %v1859_v23, %v3314_v12  ;;  %v1870_v12 = vpop.xlane.xlu0 %1869 }
 0x897   : > { %v1885_v46 = vmul.f32 %v3540_v27, %v1870_v12 }
 0x898   : > { %v1871_v33 = vsel %vm1044_vm0, %v1863_v52, 0.0 }
 0x899   : > { %v1848_v38 = vpop.f32.mrf.mxu1  ;;  %1872 = vadd.xlane.f32.xlu2 %v1871_v33  ;;  %v1889_v47 = vsub.f32 %v3524_v41, %v1885_v46  ;;  %v2801_v33 = vld [vmem:[%s3254_s26 + $0x30] sm:$0xff] }
 0x89a   : > { %v1852_v37 = vadd.f32 %v1848_v38, %v1765_v31  ;;  %2098 = vmatpush.bf16.msra.mxu3 %v2801_v33 }
 0x89b   : > { %v1893_v44 = vmul.f32 %v1889_v47, %v1889_v47 }
 0x89c   : > { %v1860_v40 = vadd.f32 %v3501_v57, %v1852_v37 }
 0x89d   : > { %v1899_v57 = vsel %vm1044_vm0, %v1893_v44, 0.0 }
 0x89e   : > { %v1864_v42 = vadd.f32 %v1860_v40, %v3319_v13  ;;  %2099 = vmatpush.bf16.msra.mxu3 %v2800_v39 }
 0x8a0   : > { %v1874_v43 = vsel %vm1044_vm0, %v1864_v42, 0.0 }
 0x8a1   : > { %1875 = vadd.xlane.f32.xlu1 %v1874_v43 }
 0x8a9   : > { %1897 = vadd.xlane.f32.xlu1 %v1896_v28 }
 0x8b1   : > { %1900 = vadd.xlane.f32.xlu1 %v1899_v57 }
 0x90c   : > { %v1873_v13 = vpop.xlane.xlu2 %1872 }
 0x90d   : > { %v1886_v17 = vmul.f32 %v3540_v27, %v1873_v13 }
 0x90f   : > { %v3552_v48 = vsub.f32 %v1863_v52, %v1886_v17 }
 0x911   : > { %v1894_v30 = vmul.f32 %v3552_v48, %v3552_v48 }
 0x913   : > { %v1902_v49 = vsel %vm1044_vm0, %v1894_v30, 0.0 }
 0x914   : > { %1903 = vadd.xlane.f32.xlu0 %v1902_v49  ;;  %v1876_v41 = vpop.xlane.xlu1 %1875  ;;  %v2798_v49 = vld [vmem:[%s3254_s26 + $0x18] sm:$0xff] }
 0x915   : > { %v1887_v10 = vmul.f32 %v3540_v27, %v1876_v41 }
 0x917   : > { %v3558_v50 = vsub.f32 %v1864_v42, %v1887_v10 }
 0x919   : > { %v1895_v51 = vmul.f32 %v3558_v50, %v3558_v50 }
 0x91b   : > { %v1905_v22 = vsel %vm1044_vm0, %v1895_v51, 0.0 }
 0x91c   : > { %1906 = vadd.xlane.f32.xlu2 %v1905_v22  ;;  %v1898_v54 = vpop.xlane.xlu1 %1897  ;;  %v2797_v22 = vld [vmem:[%s3254_s26 + $0x10] sm:$0xff] }
 0x91d   : > { %v1908_v55 = vmul.f32 %v1898_v54, %v3540_v27 }
 0x91f   : > { %v1912_v56 = vadd.f32 1e-05, %v1908_v55 }
 0x921   : > { %2922 = vrsqrt.f32 %v1912_v56  ;;  %vm1922_vm6 = vweird.f32 %v1912_v56 }
 0x924   : > { %v1901_v61 = vpop.xlane.xlu1 %1900 }
 0x925   : > { %v1909_v62 = vmul.f32 %v1901_v61, %v3540_v27 }
 0x927   : > { %v2923_v63 = vpop.eup %2922  ;;  %v1913_v0 = vadd.f32 1e-05, %v1909_v62 }
 0x928   : > { %v1917_v25 = vmul.f32 %v2923_v63, %v1912_v56  ;;  %vm1923_vm5 = vweird.f32 %v2923_v63  ;;  %v2796_v56 = vld [vmem:[%s3254_s26 + $0x8] sm:$0xff] }
 0x929   : > { %2924 = vrsqrt.f32 %v1913_v0  ;;  %vm1924_vm7 = vmor %vm1922_vm6, %vm1923_vm5  ;;  %vm1932_vm9 = vweird.f32 %v1913_v0 }
 0x92a   : > { %v1918_v29 = vmul.f32 %v2923_v63, %v1917_v25 }
 0x92c   : > { %v1919_v36 = vmul.f32 0.5, %v1918_v29 }
 0x92e   : > { %v1920_v1 = vsub.f32 1.5, %v1919_v36 }
 0x92f   : > { %v2925_v34 = vpop.eup %2924 }
 0x930   : > { %v1921_v2 = vmul.f32 %v2923_v63, %v1920_v1  ;;  %v1927_v3 = vmul.f32 %v2925_v34, %v1913_v0  ;;  %vm1933_vm8 = vweird.f32 %v2925_v34 }
 0x931   : > { %vm1934_vm10 = vmor %vm1932_vm9, %vm1933_vm8 }
 0x932   : > { %v1928_v4 = vmul.f32 %v2925_v34, %v1927_v3  ;;  %v1925_v5 = vsel %vm1924_vm7, %v2923_v63, %v1921_v2 }
 0x933   : > { %v1956_v9 = vmul.f32 %v1925_v5, %v1888_v45  ;;  %v2799_v45 = vld [vmem:[%s3254_s26 + $0x20] sm:$0xff] }
 0x934   : > { %v1929_v6 = vmul.f32 0.5, %v1928_v4  ;;  %2100 = vmatpush.bf16.msra.mxu3 %v2799_v45 }
 0x935   : > { %v1964_v59 = vmul.f32 %v2850_v8, %v1956_v9 }
 0x936   : > { %v1930_v7 = vsub.f32 1.5, %v1929_v6 }
 0x937   : > { %v3577_v58 = vadd.f32 %v2851_v15, %v1964_v59 }
 0x938   : > { %v1931_v11 = vmul.f32 %v2925_v34, %v1930_v7  ;;  %2101 = vmatpush.bf16.msra.mxu3 %v2798_v49 }
 0x93a   : > { %v1935_v14 = vsel %vm1934_vm10, %v2925_v34, %v1931_v11 }
 0x93b   : > { %v1957_v16 = vmul.f32 %v1935_v14, %v1889_v47 }
 0x93c   : > { %2102 = vmatpush.bf16.msra.mxu3 %v2797_v22 }
 0x93d   : > { %v1965_v18 = vmul.f32 %v2850_v8, %v1957_v16 }
 0x93f   : > { %v3579_v19 = vadd.f32 %v2851_v15, %v1965_v18 }
 0x940   : > { %2103 = vmatpush.bf16.msra.mxu3 %v2796_v56 }
 0x941   : > { %v1976_v20 = vpack.c.bf16 %v3579_v19, %v3577_v58 }
 0x943   : > { %2734 = vmatmul.msk.bf16.vlgmr.msra.gmra.mxu2 %vm1044_vm0, %v1976_v20 }
 0x987   : > { %v1904_v23 = vpop.xlane.xlu0 %1903 }
 0x988   : > { %v1910_v32 = vmul.f32 %v1904_v23, %v3540_v27 }
 0x98a   : > { %v1914_v24 = vadd.f32 1e-05, %v1910_v32 }
 0x98c   : > { %2926 = vrsqrt.f32 %v1914_v24  ;;  %vm1942_vm12 = vweird.f32 %v1914_v24 }
 0x98f   : > { %v1907_v52 = vpop.xlane.xlu2 %1906 }
 0x990   : > { %v1911_v31 = vmul.f32 %v1907_v52, %v3540_v27 }
 0x992   : > { %v2927_v35 = vpop.eup %2926  ;;  %v1915_v38 = vadd.f32 1e-05, %v1911_v31 }
 0x993   : > { %v1937_v37 = vmul.f32 %v2927_v35, %v1914_v24  ;;  %vm1943_vm11 = vweird.f32 %v2927_v35 }
 0x994   : > { %2928 = vrsqrt.f32 %v1915_v38  ;;  %vm1944_vm13 = vmor %vm1942_vm12, %vm1943_vm11  ;;  %vm1952_vm15 = vweird.f32 %v1915_v38 }
 0x995   : > { %v1938_v40 = vmul.f32 %v2927_v35, %v1937_v37 }
 0x997   : > { %v1939_v42 = vmul.f32 0.5, %v1938_v40 }
 0x999   : > { %v1940_v43 = vsub.f32 1.5, %v1939_v42 }
 0x99a   : > { %v2929_v12 = vpop.eup %2928 }
 0x99b   : > { %v1941_v46 = vmul.f32 %v2927_v35, %v1940_v43  ;;  %v1947_v21 = vmul.f32 %v2929_v12, %v1915_v38  ;;  %vm1953_vm14 = vweird.f32 %v2929_v12 }
 0x99c   : > { %vm1954_vm1 = vmor %vm1952_vm15, %vm1953_vm14 }
 0x99d   : > { %v1948_v47 = vmul.f32 %v2929_v12, %v1947_v21  ;;  %v1945_v28 = vsel %vm1944_vm13, %v2927_v35, %v1941_v46 }
 0x99e   : > { %v1958_v13 = vmul.f32 %v1945_v28, %v3552_v48  ;;  %v2795_v48 = vld [vmem:[%s3254_s26] sm:$0xff] }
 0x99f   : > { %v1949_v44 = vmul.f32 0.5, %v1948_v47  ;;  %2104 = vmatpush.bf16.msra.mxu3 %v2795_v48 }
 0x9a0   : > { %v1966_v10 = vmul.f32 %v2850_v8, %v1958_v13 }
 0x9a1   : > { %v1950_v57 = vsub.f32 1.5, %v1949_v44 }
 0x9a2   : > { %v1974_v53 = vadd.f32 %v2851_v15, %v1966_v10 }
 0x9a3   : > { %v1951_v17 = vmul.f32 %v2929_v12, %v1950_v57 }
 0x9a5   : > { %v1955_v30 = vsel %vm1954_vm1, %v2929_v12, %v1951_v17 }
 0x9a6   : > { %v1959_v41 = vmul.f32 %v1955_v30, %v3558_v50  ;;  %v2852_v50 = vld [vmem:[%s959_s8] ss:$0 sm:$0xff]  ;;  %s3809_s8 = scalar_lea.vmem %s3745_s14, %s3194_s29 }
 0x9a7   : > { %v2853_v6 = vld [vmem:[%s3809_s8] ss:$0 sm:$0xff]  ;;  %s3813_s8 = sld [smem:[#allocation27_spill]] (!%p2768_p6) }
 0x9a8   : > { %v1967_v51 = vmul.f32 %v2850_v8, %v1959_v41 }
 0x9aa   : > { %v1975_v54 = vadd.f32 %v2851_v15, %v1967_v51 }
 0x9ac   : > { %v1977_v55 = vpack.c.bf16 %v1975_v54, %v1974_v53 }
 0x9ae   : > { %2735 = vmatmul.msk.bf16.gmra.mxu2 %vm1044_vm0, %v1977_v55 }
 0x9c6   : > { %v2013_v60 = vpop.f32.mrf.mxu2 }
 0x9c7   : > { %v2014_v61 = vadd.f32 %v2852_v50, %v2013_v60 }
 0x9c9   : > { %v2023_v0 = vmax.f32 %v2014_v61, 0.0 }
 0x9ce   : > { %v2015_v62 = vpop.f32.mrf.mxu2 }
 0x9cf   : > { %v2016_v63 = vadd.f32 %v2852_v50, %v2015_v62  ;;  %v2854_v62 = vld [vmem:[%s3810_s19] ss:$0 sm:$0xff] }
 0x9d1   : > { %v2024_v25 = vmax.f32 %v2016_v63, 0.0 }
 0x9d3   : > { %v2027_v29 = vpack.c.bf16 %v2024_v25, %v2023_v0  ;;  %v2855_v25 = vld [vmem:[%s3811_s21] ss:$0 sm:$0xff] }
 0x9d5   : > { %2105 = vmatmul.bf16.vlgmr.msra.gmra.mxu3 %v2027_v29 }
 0xa31   : > { %v2018_v36 = vpop.f32.mrf.mxu2 }
 0xa32   : > { %v2019_v1 = vadd.f32 %v2852_v50, %v2018_v36 }
 0xa34   : > { %v2025_v3 = vmax.f32 %v2019_v1, 0.0 }
 0xa39   : > { %v2020_v34 = vpop.f32.mrf.mxu2 }
 0xa3a   : > { %v2021_v2 = vadd.f32 %v2852_v50, %v2020_v34 }
 0xa3c   : > { %v2026_v4 = vmax.f32 %v2021_v2, 0.0 }
 0xa3e   : > { %v2028_v5 = vpack.c.bf16 %v2026_v4, %v2025_v3 }
 0xa40   : > { %2110 = vmatmul.bf16.gmra.mxu3 %v2028_v5 }
 0xa58   : > { %v2106_v7 = vpop.f32.mrf.mxu3 }
 0xa59   : > { %v2107_v8 = vadd.f32 %v2853_v6, %v2106_v7 }
 0xa5b   : > { %v2116_v9 = vadd.f32 %v2107_v8, %v3577_v58 }
 0xa5d   : > { %v2120_v11 = vsel %vm1044_vm0, %v2116_v9, 0.0 }
 0xa5e   : > { %2121 = vadd.xlane.f32.xlu1 %v2120_v11 }
 0xa60   : > { %v2108_v14 = vpop.f32.mrf.mxu3 }
 0xa61   : > { %v2109_v15 = vadd.f32 %v2853_v6, %v2108_v14 }
 0xa63   : > { %v2117_v59 = vadd.f32 %v2109_v15, %v3579_v19 }
 0xa65   : > { %v2123_v16 = vsel %vm1044_vm0, %v2117_v59, 0.0 }
 0xa66   : > { %2124 = vadd.xlane.f32.xlu0 %v2123_v16 }
 0xac3   : > { %v2111_v18 = vpop.f32.mrf.mxu3 }
 0xac4   : > { %v2112_v20 = vadd.f32 %v2853_v6, %v2111_v18 }
 0xac6   : > { %v2118_v23 = vadd.f32 %v2112_v20, %v1974_v53 }
 0xac8   : > { %v2126_v32 = vsel %vm1044_vm0, %v2118_v23, 0.0 }
 0xac9   : > { %2127 = vadd.xlane.f32.xlu2 %v2126_v32 }
 0xacb   : > { %v2113_v24 = vpop.f32.mrf.mxu3 }
 0xacc   : > { %v2114_v26 = vadd.f32 %v2853_v6, %v2113_v24 }
 0xace   : > { %v2119_v52 = vadd.f32 %v2114_v26, %v1975_v54 }
 0xad0   : > { %v2129_v58 = vsel %vm1044_vm0, %v2119_v52, 0.0 }
 0xad1   : > { %2130 = vadd.xlane.f32.xlu1 %v2129_v58  ;;  %v2122_v31 = vpop.xlane.xlu1 %2121 }
 0xad2   : > { %v2132_v33 = vmul.f32 %v2122_v31, %v3540_v27 }
 0xad4   : > { %v2136_v35 = vsub.f32 %v2116_v9, %v2132_v33 }
 0xad6   : > { %v2140_v19 = vmul.f32 %v2136_v35, %v2136_v35 }
 0xad8   : > { %v2144_v38 = vsel %vm1044_vm0, %v2140_v19, 0.0 }
 0xad9   : > { %v2125_v37 = vpop.xlane.xlu0 %2124  ;;  %2145 = vadd.xlane.f32.xlu0 %v2144_v38 }
 0xada   : > { %v2133_v39 = vmul.f32 %v2125_v37, %v3540_v27 }
 0xadc   : > { %v2137_v40 = vsub.f32 %v2117_v59, %v2133_v39 }
 0xade   : > { %v2141_v42 = vmul.f32 %v2137_v40, %v2137_v40 }
 0xae0   : > { %v2147_v45 = vsel %vm1044_vm0, %v2141_v42, 0.0 }
 0xae1   : > { %2148 = vadd.xlane.f32.xlu2 %v2147_v45 }
 0xb3c   : > { %v2128_v43 = vpop.xlane.xlu2 %2127 }
 0xb3d   : > { %v2134_v12 = vmul.f32 %v2128_v43, %v3540_v27 }
 0xb3f   : > { %v3618_v46 = vsub.f32 %v2118_v23, %v2134_v12 }
 0xb41   : > { %v2142_v21 = vmul.f32 %v3618_v46, %v3618_v46 }
 0xb43   : > { %v2150_v47 = vsel %vm1044_vm0, %v2142_v21, 0.0 }
 0xb44   : > { %2151 = vadd.xlane.f32.xlu1 %v2150_v47  ;;  %v2131_v28 = vpop.xlane.xlu1 %2130 }
 0xb45   : > { %v2135_v44 = vmul.f32 %v2131_v28, %v3540_v27 }
 0xb47   : > { %v3624_v57 = vsub.f32 %v2119_v52, %v2135_v44 }
 0xb49   : > { %v2143_v13 = vmul.f32 %v3624_v57, %v3624_v57 }
 0xb4b   : > { %v2153_v17 = vsel %vm1044_vm0, %v2143_v13, 0.0 }
 0xb4c   : > { %v2146_v30 = vpop.xlane.xlu0 %2145  ;;  %2154 = vadd.xlane.f32.xlu0 %v2153_v17 }
 0xb4d   : > { %v2156_v49 = vmul.f32 %v2146_v30, %v3540_v27 }
 0xb4f   : > { %v2160_v41 = vadd.f32 1e-05, %v2156_v49 }
 0xb51   : > { %2930 = vrsqrt.f32 %v2160_v41  ;;  %vm2170_vm3 = vweird.f32 %v2160_v41 }
 0xb54   : > { %v2149_v10 = vpop.xlane.xlu2 %2148 }
 0xb55   : > { %v2157_v51 = vmul.f32 %v2149_v10, %v3540_v27 }
 0xb57   : > { %v2931_v22 = vpop.eup %2930  ;;  %v2161_v53 = vadd.f32 1e-05, %v2157_v51 }
 0xb58   : > { %v2165_v54 = vmul.f32 %v2931_v22, %v2160_v41  ;;  %vm2171_vm2 = vweird.f32 %v2931_v22 }
 0xb59   : > { %2932 = vrsqrt.f32 %v2161_v53  ;;  %vm2172_vm4 = vmor %vm2170_vm3, %vm2171_vm2  ;;  %vm2180_vm6 = vweird.f32 %v2161_v53 }
 0xb5a   : > { %v2166_v55 = vmul.f32 %v2931_v22, %v2165_v54 }
 0xb5c   : > { %v2167_v56 = vmul.f32 0.5, %v2166_v55 }
 0xb5e   : > { %v2168_v48 = vsub.f32 1.5, %v2167_v56 }
 0xb5f   : > { %v2933_v60 = vpop.eup %2932 }
 0xb60   : > { %v2169_v50 = vmul.f32 %v2931_v22, %v2168_v48  ;;  %v2175_v61 = vmul.f32 %v2933_v60, %v2161_v53  ;;  %vm2181_vm5 = vweird.f32 %v2933_v60 }
 0xb61   : > { %vm2182_vm7 = vmor %vm2180_vm6, %vm2181_vm5 }
 0xb62   : > { %v2173_v63 = vsel %vm2172_vm4, %v2931_v22, %v2169_v50  ;;  %v2176_v0 = vmul.f32 %v2933_v60, %v2175_v61 }
 0xb63   : > { %v2204_v29 = vmul.f32 %v2173_v63, %v2136_v35 }
 0xb64   : > { %v2177_v36 = vmul.f32 0.5, %v2176_v0 }
 0xb65   : > { %v2212_v1 = vmul.f32 %v2854_v62, %v2204_v29 }
 0xb66   : > { %v2178_v34 = vsub.f32 1.5, %v2177_v36 }
 0xb67   : > { %v2220_v2 = vadd.f32 %v2855_v25, %v2212_v1 }
 0xb68   : > { %v2179_v3 = vmul.f32 %v2933_v60, %v2178_v34 }
 0xb69   : > { %2224 = vst.msk [vmem:[%s3800_s7] sm:$0xff] %vm1044_vm0, %v2220_v2 }
 0xb6a   : > { %v2183_v4 = vsel %vm2182_vm7, %v2933_v60, %v2179_v3 }
 0xb6b   : > { %v2205_v5 = vmul.f32 %v2183_v4, %v2137_v40 }
 0xb6d   : > { %v2213_v6 = vmul.f32 %v2854_v62, %v2205_v5 }
 0xb6f   : > { %v2221_v7 = vadd.f32 %v2855_v25, %v2213_v6 }
 0xb71   : > { %2225 = vst.msk [vmem:[%s3800_s7 + $0x8] sm:$0xff] %vm1044_vm0, %v2221_v7 }
 0xbb7   : > { %v2152_v8 = vpop.xlane.xlu1 %2151 }
 0xbb8   : > { %v2158_v9 = vmul.f32 %v2152_v8, %v3540_v27 }
 0xbba   : > { %v2162_v11 = vadd.f32 1e-05, %v2158_v9 }
 0xbbc   : > { %2934 = vrsqrt.f32 %v2162_v11  ;;  %vm2190_vm9 = vweird.f32 %v2162_v11 }
 0xbbf   : > { %v2155_v14 = vpop.xlane.xlu0 %2154 }
 0xbc0   : > { %v2159_v15 = vmul.f32 %v2155_v14, %v3540_v27 }
 0xbc2   : > { %v2935_v59 = vpop.eup %2934  ;;  %v2163_v16 = vadd.f32 1e-05, %v2159_v15 }
 0xbc3   : > { %v2185_v18 = vmul.f32 %v2935_v59, %v2162_v11  ;;  %vm2191_vm8 = vweird.f32 %v2935_v59 }
 0xbc4   : > { %2936 = vrsqrt.f32 %v2163_v16  ;;  %vm2192_vm10 = vmor %vm2190_vm9, %vm2191_vm8  ;;  %vm2200_vm12 = vweird.f32 %v2163_v16 }
 0xbc5   : > { %v2186_v20 = vmul.f32 %v2935_v59, %v2185_v18 }
 0xbc7   : > { %v2187_v23 = vmul.f32 0.5, %v2186_v20 }
 0xbc9   : > { %v2188_v32 = vsub.f32 1.5, %v2187_v23 }
 0xbca   : > { %v2937_v24 = vpop.eup %2936 }
 0xbcb   : > { %v2189_v26 = vmul.f32 %v2935_v59, %v2188_v32  ;;  %v2195_v52 = vmul.f32 %v2937_v24, %v2163_v16  ;;  %vm2201_vm11 = vweird.f32 %v2937_v24 }
 0xbcc   : > { %vm2202_vm13 = vmor %vm2200_vm12, %vm2201_vm11 }
 0xbcd   : > { %v2193_v58 = vsel %vm2192_vm10, %v2935_v59, %v2189_v26  ;;  %v2196_v31 = vmul.f32 %v2937_v24, %v2195_v52 }
 0xbce   : > { %v2206_v33 = vmul.f32 %v2193_v58, %v3618_v46 }
 0xbcf   : > { %v2197_v35 = vmul.f32 0.5, %v2196_v31 }
 0xbd0   : > { %v2214_v19 = vmul.f32 %v2854_v62, %v2206_v33 }
 0xbd1   : > { %v2198_v27 = vsub.f32 1.5, %v2197_v35 }
 0xbd2   : > { %v2222_v38 = vadd.f32 %v2855_v25, %v2214_v19 }
 0xbd3   : > { %v2199_v37 = vmul.f32 %v2937_v24, %v2198_v27 }
 0xbd4   : > { %2226 = vst.msk [vmem:[%s3800_s7 + $0x10] sm:$0xff] %vm1044_vm0, %v2222_v38 }
 0xbd5   : > { %v2203_v39 = vsel %vm2202_vm13, %v2937_v24, %v2199_v37 }
 0xbd6   : > { %v2207_v40 = vmul.f32 %v2203_v39, %v3624_v57 }
 0xbd8   : > { %v2215_v42 = vmul.f32 %v2854_v62, %v2207_v40  ;;  %2231 = sbr.rel (%p2768_p6) target bundleno = 3216 (0xc90), region = 127 }
 0xbda   : > { %v2223_v45 = vadd.f32 %v2855_v25, %v2215_v42 }
 0xbdc   : > { %2227 = vst.msk [vmem:[%s3800_s7 + $0x18] sm:$0xff] %vm1044_vm0, %v2223_v45 }
 0xbdd   : > { %v2299_v43 = vld [vmem:[%s3812_s18 + $0x18] sm:$0xff]  ;;  %v2298_v12 = vld [vmem:[%s3812_s18 + $0x10] sm:$0xff]  ;;  %v2232_v46 = vsel %vm1044_vm0, %v2220_v2, 0.0  ;;  %v2233_v21 = vsel %vm1044_vm0, %v2221_v7, 0.0  ;;  %v3040_v28 = vmov 16.0   ;;  %v2249_v44 = vsel %vm1044_vm0, %v2222_v38, 0.0 }
 0xbde   : > { %2316 = vmatpush.msra.mxu1 %v2299_v43  ;;  %v2234_v47 = vadd.f32 %v2233_v21, %v2232_v46  ;;  %2940 = vrcp.f32 %v3040_v28  ;;  %v2250_v57 = vsel %vm1044_vm0, %v2223_v45, 0.0  ;;  %v2266_v13 = vld [vmem:[%s3813_s8 + $0x18] sm:$0xff]  ;;  %v2265_v17 = vld [vmem:[%s3813_s8 + $0x10] sm:$0xff]  ;;  %v2297_v30 = vld [vmem:[%s3812_s18 + $0x8] sm:$0xff]  ;;  %vm2259_vm15 = vcmask 1040384  }
 0xbdf   : > { %v2251_v49 = vadd.f32 %v2250_v57, %v2249_v44  ;;  %2286 = vmatpush.msra.mxu0 %v2266_v13  ;;  %v2264_v10 = vld [vmem:[%s3813_s8 + $0x8] sm:$0xff]  ;;  %v2296_v51 = vld [vmem:[%s3812_s18] sm:$0xff]  ;;  %vm2261_vm1 = vcmask 254976   ;;  %vm2294_vm2 = vcmask 9216   ;;  %vm2343_vm5 = vcmask 1024  }
 0xbe0   : > { %2317 = vmatpush.msra.mxu1 %v2298_v12  ;;  %v2235_v41 = vrot.slane %v2234_v47, 4  ;;  %v2263_v54 = vld [vmem:[%s3813_s8] sm:$0xff] }
 0xbe1   : > { %v2252_v22 = vrot.slane %v2251_v49, 4  ;;  %2287 = vmatpush.msra.mxu0 %v2265_v17  ;;  %v2938_v6 = vld [vmem:[#allocation3] ss:$0 sm:$0xff] }
 0xbe2   : > { %2318 = vmatpush.msra.mxu1 %v2297_v30  ;;  %v2236_v53 = vadd.f32 %v2235_v41, %v2234_v47  ;;  %v2939_v7 = vld [vmem:[%s3814_s23] ss:$0 sm:$0xff] }
 0xbe3   : > { %v2253_v55 = vadd.f32 %v2252_v22, %v2251_v49  ;;  %2288 = vmatpush.msra.mxu0 %v2264_v10 }
 0xbe4   : > { %v2941_v56 = vpop.eup %2940  ;;  %2319 = vmatpush.msra.mxu1 %v2296_v51  ;;  %v2237_v48 = vrot.slane %v2236_v53, 2 }
 0xbe5   : > { %v2242_v60 = vmul.f32 16.0, %v2941_v56  ;;  %v2254_v50 = vrot.slane %v2253_v55, 2  ;;  %2289 = vmatpush.msra.mxu0 %v2263_v54  ;;  %vm2246_vm14 = vweird.f32 %v2941_v56 }
 0xbe6   : > { %v2238_v61 = vadd.f32 %v2237_v48, %v2236_v53 }
 0xbe7   : > { %v2243_v62 = vsub.f32 1.0, %v2242_v60  ;;  %v2255_v63 = vadd.f32 %v2254_v50, %v2253_v55 }
 0xbe8   : > { %v2239_v0 = vrot.slane %v2238_v61, 1 }
 0xbe9   : > { %v2244_v25 = vmul.f32 %v2941_v56, %v2243_v62  ;;  %v2256_v29 = vrot.slane %v2255_v63, 1 }
 0xbea   : > { %v2240_v36 = vadd.f32 %v2239_v0, %v2238_v61 }
 0xbeb   : > { %v2245_v1 = vadd.f32 %v2941_v56, %v2244_v25  ;;  %v2257_v34 = vadd.f32 %v2256_v29, %v2255_v63 }
 0xbed   : > { %v2247_v2 = vsel %vm2246_vm14, %v2941_v56, %v2245_v1 }
 0xbee   : > { %v2248_v3 = vmul.f32 %v2247_v2, %v2240_v36  ;;  %v2258_v4 = vmul.f32 %v2257_v34, %v2247_v2 }
 0xbf0   : > { %v2260_v5 = vsel %vm2259_vm15, %v2248_v3, %v2258_v4 }
 0xbf1   : > { %2262 = vst.msk [vmem:[#allocation4] sm:$0x3] %vm2261_vm1, %v2260_v5  ;;  %2770 = vmatmul.msk.f32.vlgmr.msra.gmra.mxu1 %vm1044_vm0, %v2260_v5  ;;  %2769 = vmatmul.msk.f32.vlgmr.msra.gmra.mxu0 %vm1044_vm0, %v2260_v5 }
 0xc6e   : > { %v2321_v8 = vpop.f32.mrf.mxu1  ;;  %v2291_v9 = vpop.f32.mrf.mxu0 }
 0xc6f   : > { %v2322_v11 = vadd.f32 %v2938_v6, %v2321_v8  ;;  %v2292_v14 = vadd.f32 %v2939_v7, %v2291_v9 }
 0xc71   : > { %v2324_v15 = vsub.f32 0.0, %v2322_v11  ;;  %2295 = vst.msk [vmem:[#allocation6] sm:$0x3] %vm2294_vm2, %v2292_v14 }
 0xc73   : > { %v2325_v59 = vmul.f32 1.442695, %v2324_v15 }
 0xc75   : > { %2942 = vpow2.f32 %v2325_v59 }
 0xc7b   : > { %v2943_v16 = vpop.eup %2942 }
 0xc7c   : > { %v2327_v18 = vadd.f32 1.0, %v2943_v16 }
 0xc7e   : > { %2944 = vrcp.f32 %v2327_v18  ;;  %v2339_v24 = vand.u32 2147483648, %v2327_v18  ;;  %v2337_v52 = vand.u32 2147483647, %v2327_v18  ;;  %vm2333_vm3 = vweird.f32 %v2327_v18 }
 0xc80   : > { %v2340_v31 = vor.u32 1.1754944e-38, %v2339_v24  ;;  %vm2338_vm6 = vcmp.eq.f32.partialorder %v2337_v52, 8.507059e+37 }
 0xc84   : > { %v2945_v20 = vpop.eup %2944 }
 0xc85   : > { %v2329_v23 = vmul.f32 %v2945_v20, %v2327_v18  ;;  %vm2334_vm0 = vweird.f32 %v2945_v20 }
 0xc86   : > { %vm2335_vm4 = vmor %vm2333_vm3, %vm2334_vm0 }
 0xc87   : > { %v2330_v32 = vsub.f32 1.0, %v2329_v23 }
 0xc89   : > { %v2331_v26 = vmul.f32 %v2945_v20, %v2330_v32 }
 0xc8b   : > { %v2332_v58 = vadd.f32 %v2945_v20, %v2331_v26 }
 0xc8d   : > { %v2336_v33 = vsel %vm2335_vm4, %v2945_v20, %v2332_v58 }
 0xc8e   : > { %v2341_v35 = vsel %vm2338_vm6, %v2340_v31, %v2336_v33 }
 0xc8f   : > { %2344 = vst.msk [vmem:[%s3815_s30] sm:$0x3] %vm2343_vm5, %v2341_v35 }
 0xc90 PF: > { %s3816_s26 = sld [smem:[#allocation13_spill]]  ;;  %s3041_s5 = smov [#allocation4]  }
 0xc91   : > { %s3819_s17 = sld [smem:[#allocation31_spill]]  ;;  %s2366_s4 = sshll.u32 %s3041_s5, 4  ;;  %s2367_s4 = int_to_ptr.vmem [resolvable:$true] %s2366_s4 }
 0xc92   : > { %s3042_s21 = smov [#allocation6]   ;;  %s3820_s28 = sld [smem:[#allocation32_spill]] }
 0xc93   : > { %s2380_s1 = sshll.u32 %s3042_s21, 4  ;;  %s2381_s1 = int_to_ptr.vmem [resolvable:$true] %s2380_s1 }
 0xc96   : > { %s3817_s3 = sadd.s32 4294967295, %s3816_s26  }
 0xc97   : > { %p3700_p7 = scmp.eq.s32.totalorder %s3817_s3, 1  ;;  %s2368_s19 = sshll.u32 %s3819_s17, 4  ;;  %s2369_s19 = int_to_ptr.hbm [resolvable:$true] %s2368_s19 }
 0xc98   : > { %s2382_s25 = sshll.u32 %s3820_s28, 4  ;;  %s2383_s25 = int_to_ptr.hbm [resolvable:$true] %s2382_s25 }
 0xc99   : > { %2804 = dma.vmem_to_hbm [thread:$0]  (%p3700_p7), %s2367_s4, 32, %s2369_s19, [#allocation5]  }
 0xc9a   : > { %2806 = dma.vmem_to_hbm [thread:$0]  (%p3700_p7), %s2381_s1, 32, %s2383_s25, [#allocation7]  }
 0xc9b   : > { %3017 = dma.done.wait (%p3700_p7), [#allocation5], 32  }
 0xc9c   : > { %3019 = vsyncadd (%p3700_p7), [#allocation5], 4294967264 }
 0xc9d   : > { %3021 = dma.done.wait (%p3700_p7), [#allocation7], 32  }
 0xc9e   : > { %3023 = vsyncadd (%p3700_p7), [#allocation7], 4294967264 }
 0xc9f PF: > { %s3821_s22 = sld [smem:[#allocation13_spill]] }
 0xca0   : > { %s3822_s27 = sld [smem:[#allocation12_spill]] }
 0xca1   : > { %s3823_s28 = sld [smem:[#allocation14_spill]] }
 0xca5   : > { %s39_s6 = sadd.s32 1, %s3821_s22  }
 0xca6   : > { %p36_p8 = scmp.ge.s32.totalorder %s39_s6, 4  }
 0xca8   :  { %38 = sbr.rel (!%p36_p8) target bundleno = 20 (0x14), region = 238 }
 0xcad   :  { %2419 = vsyncpa [#allocation5], 1 }
 0xcae   :  { %2421 = vsyncpa [#allocation5 + $0x1], 1 }
 0xcaf   :  { %2422 = vsyncpa [#allocation7], 1 }
 0xcb0   :  { %2423 = vsyncmov [#allocation2] }
 0xcb3   :  { %s2424_s23 = vpop.sfrf %2423 }
 0xcb4   :  { %p2780_p9 = scmp.ne.s32.totalorder %s2424_s23, 0 }
 0xcb6   :  { %2428 = shalt.err (%p2780_p9)  }

</bundles_post_ra>
